<compile_context>
chip_gen: v7x
topology: tpu7x:2x2x1
jax: 0.10.0
libtpu: 0.0.40
codegen_flags: <defaults>
</compile_context>

<pallas_src>
import jax
import jax.numpy as jnp
from jax.experimental import pallas as pl
from jax.experimental.pallas import tpu as pltpu


def _activation(name):
    # equivalent of activation_helper(...) for the common choices
    return {
        "relu": lambda x: jnp.maximum(x, 0.0),
        "sigmoid": jax.nn.sigmoid,
        "tanh": jnp.tanh,
    }[name]


def make_mlp_kernel(n_extra, activation):
    act = _activation(activation)

    def kernel(ax_ref, w0_ref, b0_ref, *rest):
        # ax_ref : (lag*C, T_TILE)  bf16   ax_flat[i*C+c, t] = ax[i][t, c]
        # w0_ref : (H0, lag*C)      bf16   w0_flat[h, i*C+c] = W0[h, c, lag-1-i]
        # b0_ref : (H0, 1)          f32
        # rest   : (w1, b1, ..., w_last, b_last, out_ref)
        #          middle wk : (d_out, d_in) bf16 ; w_last : (d_in, 1) f32
        #          bk        : (d_out, 1)   f32  ; out_ref : (1, T_TILE) f32
        out_ref = rest[-1]
        layer_refs = rest[:-1]

        # First Conv1d(num_series, H0, lag): single fused MXU matmul
        # (replaces `lag` K=num_series matmuls + VPU accumulate adds).
        h = jnp.dot(w0_ref[...], ax_ref[...],
                    preferred_element_type=jnp.float32) + b0_ref[...]

        for j in range(n_extra):
            w_ref = layer_refs[2 * j]
            b = layer_refs[2 * j + 1][...]
            h = act(h)                               # f32 elementwise (v5e-safe)
            if j == n_extra - 1:
                # Final (d_in -> 1) projection on VPU + XLU (sublane reduce):
                # avoids an M=1 MXU push and keeps the output lane-dense.
                h = jnp.sum(w_ref[...] * h, axis=0, keepdims=True) + b
            else:
                h = jnp.dot(w_ref[...], h.astype(w_ref.dtype),
                            preferred_element_type=jnp.float32) + b

        out_ref[...] = h                             # (1, T_TILE), lane-dense

    return kernel


def mlp_forward(ax, weights, biases, lag, activation="relu", t_tile=2048):
    """ax: (lag, T, num_series); weights/biases in PyTorch Conv1d layout.

    weights[0]: (hidden0, num_series, lag); weights[k>0]: (d_out, d_in, 1).
    Returns (1, T, 1), matching the PyTorch forward().
    """
    lag_, T, C = ax.shape
    assert lag_ == lag
    H0 = weights[0].shape[0]
    n_extra = len(weights) - 1
    assert n_extra >= 1 and weights[-1].shape[0] == 1

    # ----- layout plumbing (plain JAX, outside the kernel) ------------------
    # ax_flat[i*C + c, t] = ax[i, t, c]      -> (lag*C, T), T on lanes
    ax_flat = jnp.transpose(ax, (0, 2, 1)).reshape(lag * C, T)
    # w0_flat[h, i*C + c] = W0[h, c, lag-1-i] (fuses lag loop into one matmul)
    w0_flat = jnp.transpose(weights[0][:, :, ::-1], (0, 2, 1)).reshape(H0, lag * C)

    params = [w0_flat.astype(jnp.bfloat16),
              biases[0].reshape(H0, 1).astype(jnp.float32)]
    flops_inner = lag * C * H0
    for idx, (w, b) in enumerate(zip(weights[1:], biases[1:])):
        d_out, d_in = int(w.shape[0]), int(w.shape[1])
        flops_inner += d_in * d_out
        if idx == n_extra - 1:
            # Final projection kept f32 as a (d_in, 1) column (VPU path).
            params.append(jnp.transpose(w[:, :, 0], (1, 0)).astype(jnp.float32))
        else:
            params.append(w[:, :, 0].astype(jnp.bfloat16))
        params.append(b.reshape(d_out, 1).astype(jnp.float32))

    # ----- T tiling ----------------------------------------------------------
    # Big lane-dim tiles: per-grid-step overhead (~0.35 us) amortised, large
    # DMAs; VMEM footprint stays tiny (ax tile (lag*C, T_TILE) bf16 + hidden
    # (H, T_TILE) f32 temporaries -- hundreds of KiB at T_TILE=2048).
    if T <= t_tile:
        T_TILE = max(128, ((T + 127) // 128) * 128)
    else:
        T_TILE = t_tile                      # multiple of 128 by construction
    T_pad = pl.cdiv(T, T_TILE) * T_TILE
    if T_pad != T:
        ax_flat = jnp.pad(ax_flat, ((0, 0), (0, T_pad - T)))
    ax_flat = ax_flat.astype(jnp.bfloat16)

    in_specs = [pl.BlockSpec((lag * C, T_TILE), lambda i: (0, i))]
    for p in params:
        # constant index map -> block stays resident in VMEM across the grid
        in_specs.append(pl.BlockSpec(p.shape, lambda i: (0, 0)))

    n_transc = 0 if activation == "relu" else \
        int(T_pad) * sum(int(w.shape[1]) for w in weights[1:])
    cost = pl.CostEstimate(
        flops=2 * int(T_pad) * flops_inner,
        transcendentals=n_transc,
        bytes_accessed=int(ax_flat.size) * 2
        + sum(int(p.size) * p.dtype.itemsize for p in params)
        + int(T_pad) * 4,
    )

    out = pl.pallas_call(
        make_mlp_kernel(n_extra, activation),
        out_shape=jax.ShapeDtypeStruct((1, T_pad), jnp.float32),
        grid=(T_pad // T_TILE,),
        in_specs=in_specs,
        out_specs=pl.BlockSpec((1, T_TILE), lambda i: (0, i)),
        compiler_params=pltpu.CompilerParams(
            dimension_semantics=("parallel",)),   # shards across v7x's 2 TCs
        cost_estimate=cost,
    )(ax_flat, *params)

    return out[:, :T].reshape(1, T, 1)            # (1, T, 1), matches PyTorch


def mlp_reference(ax, weights, biases, lag, activation="relu"):
    act = _activation(activation)
    T = ax.shape[1]
    H0 = weights[0].shape[0]
    ret = jnp.zeros((T, H0), jnp.float32)
    for i in range(lag):
        ret = ret + ax[i] @ weights[0][:, :, lag - 1 - i].T
    ret = ret + biases[0]
    for w, b in zip(weights[1:], biases[1:]):
        ret = act(ret)
        ret = ret @ w[:, :, 0].T + b
    return ret[None, :, :]


def _make_params(key, num_series, lag, hidden):
    keys = jax.random.split(key, 2 * (len(hidden) + 1))
    weights, biases = [], []
    k = 0
    w0 = 0.1 * jax.random.normal(keys[k], (hidden[0], num_series, lag), jnp.float32); k += 1
    b0 = 0.1 * jax.random.normal(keys[k], (hidden[0],), jnp.float32); k += 1
    weights.append(w0); biases.append(b0)
    for d_in, d_out in zip(hidden, hidden[1:] + [1]):
        w = 0.1 * jax.random.normal(keys[k], (d_out, d_in, 1), jnp.float32); k += 1
        b = 0.1 * jax.random.normal(keys[k], (d_out,), jnp.float32); k += 1
        weights.append(w); biases.append(b)
    return weights, biases


if __name__ == "__main__":
    key = jax.random.PRNGKey(0)
    k_ax, k_p, k_ax2, k_p2 = jax.random.split(key, 4)

    # --- main check: T > default tile (2 grid steps + tail padding) ---------
    T, num_series, lag = 2500, 4, 3
    hidden = [32, 32]
    activation = "relu"

    # MLP.ax: list of `lag` tensors of shape (T, num_series), stacked here.
    ax = jax.random.normal(k_ax, (lag, T, num_series), jnp.float32)
    weights, biases = _make_params(k_p, num_series, lag, hidden)

    out = mlp_forward(ax, weights, biases, lag, activation)
    out = jax.block_until_ready(out)
    ref = mlp_reference(ax, weights, biases, lag, activation)
    assert out.shape == (1, T, 1), out.shape
    assert jnp.allclose(out, ref, rtol=2e-2, atol=2e-2), \
        float(jnp.max(jnp.abs(out - ref)))

    # --- secondary check: single-tile path + EUP activation -----------------
    T2 = 300
    ax2 = jax.random.normal(k_ax2, (lag, T2, num_series), jnp.float32)
    weights2, biases2 = _make_params(k_p2, num_series, lag, [32])
    out2 = mlp_forward(ax2, weights2, biases2, lag, "sigmoid")
    out2 = jax.block_until_ready(out2)
    ref2 = mlp_reference(ax2, weights2, biases2, lag, "sigmoid")
    assert out2.shape == (1, T2, 1), out2.shape
    assert jnp.allclose(out2, ref2, rtol=2e-2, atol=2e-2), \
        float(jnp.max(jnp.abs(out2 - ref2)))

    print("KERNEL_OK")
</pallas_src>

<mosaic_0001>
module attributes {stable_mosaic.version = 11 : i64} {
  func.func @kernel(%arg0: i32, %arg1: memref<12x2048xbf16, #tpu.memory_space<vmem>>, %arg2: memref<32x12xbf16, #tpu.memory_space<vmem>>, %arg3: memref<32x1xf32, #tpu.memory_space<vmem>>, %arg4: memref<32x32xbf16, #tpu.memory_space<vmem>>, %arg5: memref<32x1xf32, #tpu.memory_space<vmem>>, %arg6: memref<32x1xf32, #tpu.memory_space<vmem>>, %arg7: memref<1x1xf32, #tpu.memory_space<vmem>>, %arg8: memref<1x2048xf32, #tpu.memory_space<vmem>>) attributes {dimension_semantics = [#tpu.dimension_semantics<parallel>], iteration_bounds = array<i64: 2>, scalar_prefetch = 0 : i64, scratch_operands = 0 : i64, tpu.core_type = #tpu.core_type<tc>, window_params = [{transform_indices = @transform_0, window_bounds = array<i64: 12, 2048>}, {pipeline_mode = #tpu.pipeline_mode<synchronous>, transform_indices = @transform_1, window_bounds = array<i64: 32, 12>}, {pipeline_mode = #tpu.pipeline_mode<synchronous>, transform_indices = @transform_2, window_bounds = array<i64: 32, 1>}, {pipeline_mode = #tpu.pipeline_mode<synchronous>, transform_indices = @transform_3, window_bounds = array<i64: 32, 32>}, {pipeline_mode = #tpu.pipeline_mode<synchronous>, transform_indices = @transform_4, window_bounds = array<i64: 32, 1>}, {pipeline_mode = #tpu.pipeline_mode<synchronous>, transform_indices = @transform_5, window_bounds = array<i64: 32, 1>}, {pipeline_mode = #tpu.pipeline_mode<synchronous>, transform_indices = @transform_6, window_bounds = array<i64: 1, 1>}, {transform_indices = @transform_7, window_bounds = array<i64: 1, 2048>}]} {
    %c0 = arith.constant 0 : index
    %c0_0 = arith.constant 0 : index
    %0 = vector.load %arg2[%c0, %c0_0] : memref<32x12xbf16, #tpu.memory_space<vmem>>, vector<32x12xbf16>
    %c0_1 = arith.constant 0 : index
    %c0_2 = arith.constant 0 : index
    %1 = vector.load %arg1[%c0_1, %c0_2] : memref<12x2048xbf16, #tpu.memory_space<vmem>>, vector<12x2048xbf16>
    %cst = arith.constant dense<0.000000e+00> : vector<32x2048xf32>
    %2 = tpu.matmul %0, %1, %cst {dimension_numbers = #tpu.dot_dimension_numbers<[1], [0], [0], [1], [0, 0, 1, 1], [], []>} : vector<32x12xbf16>, vector<12x2048xbf16>, vector<32x2048xf32> -> vector<32x2048xf32>
    %c0_3 = arith.constant 0 : index
    %c0_4 = arith.constant 0 : index
    %3 = vector.load %arg3[%c0_3, %c0_4] : memref<32x1xf32, #tpu.memory_space<vmem>>, vector<32x1xf32>
    %4 = vector.broadcast %3 : vector<32x1xf32> to vector<32x2048xf32>
    %5 = arith.addf %2, %4 : vector<32x2048xf32>
    %c0_5 = arith.constant 0 : index
    %c0_6 = arith.constant 0 : index
    %6 = vector.load %arg5[%c0_5, %c0_6] : memref<32x1xf32, #tpu.memory_space<vmem>>, vector<32x1xf32>
    %cst_7 = arith.constant 0.000000e+00 : f32
    %7 = vector.broadcast %cst_7 : f32 to vector<32x2048xf32>
    %8 = arith.maximumf %5, %7 : vector<32x2048xf32>
    %c0_8 = arith.constant 0 : index
    %c0_9 = arith.constant 0 : index
    %9 = vector.load %arg4[%c0_8, %c0_9] : memref<32x32xbf16, #tpu.memory_space<vmem>>, vector<32x32xbf16>
    %10 = arith.truncf %8 : vector<32x2048xf32> to vector<32x2048xbf16>
    %cst_10 = arith.constant dense<0.000000e+00> : vector<32x2048xf32>
    %11 = tpu.matmul %9, %10, %cst_10 {dimension_numbers = #tpu.dot_dimension_numbers<[1], [0], [0], [1], [0, 0, 1, 1], [], []>} : vector<32x32xbf16>, vector<32x2048xbf16>, vector<32x2048xf32> -> vector<32x2048xf32>
    %12 = vector.broadcast %6 : vector<32x1xf32> to vector<32x2048xf32>
    %13 = arith.addf %11, %12 : vector<32x2048xf32>
    %c0_11 = arith.constant 0 : index
    %c0_12 = arith.constant 0 : index
    %14 = vector.load %arg7[%c0_11, %c0_12] : memref<1x1xf32, #tpu.memory_space<vmem>>, vector<1x1xf32>
    %cst_13 = arith.constant 0.000000e+00 : f32
    %15 = vector.broadcast %cst_13 : f32 to vector<32x2048xf32>
    %16 = arith.maximumf %13, %15 : vector<32x2048xf32>
    %c0_14 = arith.constant 0 : index
    %c0_15 = arith.constant 0 : index
    %17 = vector.load %arg6[%c0_14, %c0_15] : memref<32x1xf32, #tpu.memory_space<vmem>>, vector<32x1xf32>
    %18 = vector.broadcast %17 : vector<32x1xf32> to vector<32x2048xf32>
    %19 = arith.mulf %18, %16 : vector<32x2048xf32>
    %cst_16 = arith.constant dense<0.000000e+00> : vector<2048xf32>
    %20 = vector.multi_reduction <add>, %19, %cst_16 [0] : vector<32x2048xf32> to vector<2048xf32>
    %21 = vector.shape_cast %20 : vector<2048xf32> to vector<1x2048xf32>
    %22 = vector.broadcast %14 : vector<1x1xf32> to vector<1x2048xf32>
    %23 = arith.addf %21, %22 : vector<1x2048xf32>
    %c0_17 = arith.constant 0 : index
    %c0_18 = arith.constant 0 : index
    %24 = vector.load %arg8[%c0_17, %c0_18] : memref<1x2048xf32, #tpu.memory_space<vmem>>, vector<1x2048xf32>
    tpu.vector_store %arg8[%c0_17, %c0_18], %23 {strides = array<i32>} : memref<1x2048xf32, #tpu.memory_space<vmem>>, vector<1x2048xf32>,
    return
  }
  func.func @transform_0(%arg0: i32) -> (i32, i32) {
    %c0_i32 = arith.constant 0 : i32
    %c0_i32_0 = arith.constant 0 : i32
    return %c0_i32, %arg0 : i32, i32
  }
  func.func @transform_1(%arg0: i32) -> (i32, i32) {
    %c0_i32 = arith.constant 0 : i32
    %c0_i32_0 = arith.constant 0 : i32
    %c0_i32_1 = arith.constant 0 : i32
    return %c0_i32, %c0_i32_0 : i32, i32
  }
  func.func @transform_2(%arg0: i32) -> (i32, i32) {
    %c0_i32 = arith.constant 0 : i32
    %c0_i32_0 = arith.constant 0 : i32
    %c0_i32_1 = arith.constant 0 : i32
    return %c0_i32, %c0_i32_0 : i32, i32
  }
  func.func @transform_3(%arg0: i32) -> (i32, i32) {
    %c0_i32 = arith.constant 0 : i32
    %c0_i32_0 = arith.constant 0 : i32
    %c0_i32_1 = arith.constant 0 : i32
    return %c0_i32, %c0_i32_0 : i32, i32
  }
  func.func @transform_4(%arg0: i32) -> (i32, i32) {
    %c0_i32 = arith.constant 0 : i32
    %c0_i32_0 = arith.constant 0 : i32
    %c0_i32_1 = arith.constant 0 : i32
    return %c0_i32, %c0_i32_0 : i32, i32
  }
  func.func @transform_5(%arg0: i32) -> (i32, i32) {
    %c0_i32 = arith.constant 0 : i32
    %c0_i32_0 = arith.constant 0 : i32
    %c0_i32_1 = arith.constant 0 : i32
    return %c0_i32, %c0_i32_0 : i32, i32
  }
  func.func @transform_6(%arg0: i32) -> (i32, i32) {
    %c0_i32 = arith.constant 0 : i32
    %c0_i32_0 = arith.constant 0 : i32
    %c0_i32_1 = arith.constant 0 : i32
    return %c0_i32, %c0_i32_0 : i32, i32
  }
  func.func @transform_7(%arg0: i32) -> (i32, i32) {
    %c0_i32 = arith.constant 0 : i32
    %c0_i32_0 = arith.constant 0 : i32
    return %c0_i32, %arg0 : i32, i32
  }
}

</mosaic_0001>

<bundles_post_ra>
// kernel: tpu_custom_call.1
= control target key start
LH: loop header
LB: loop body
LE: loop exit
PB: predicated region body
PF: predicated region fallthrough
CT: control target
= control target key end

     0   :  { %s2956_s0 = inlined_call_operand.hbm [shape: bf16[12,4096], index: 0, kind: input, shape index: {}]   ;;  %s2957_s1 = inlined_call_operand.vmem [shape: bf16[32,12], index: 1, kind: input, shape index: {}]   ;;  %s2958_s2 = inlined_call_operand.vmem [shape: f32[32,1], index: 2, kind: input, shape index: {}]   ;;  %s2959_s3 = inlined_call_operand.vmem [shape: bf16[32,32], index: 3, kind: input, shape index: {}]   ;;  %s2960_s4 = inlined_call_operand.vmem [shape: f32[32,1], index: 4, kind: input, shape index: {}]   ;;  %s2961_s5 = inlined_call_operand.vmem [shape: f32[32,1], index: 5, kind: input, shape index: {}]   ;;  %s2962_s6 = inlined_call_operand.<no memory space> [shape: f32[1,1], index: 6, kind: input, shape index: {}]   ;;  %s2963_s7 = inlined_call_operand.hbm [shape: f32[1,4096], index: 7, kind: output, shape index: {}]  }
   0x1   :  { %v12_v0 = vstv %s2962_s6 }
   0x2   :  { %13 = vst [vmem:[#allocation2] sm:$0x1] %v12_v0 }
   0x3   :  { %14 = vsyncpa [#allocation4], 0 }
   0x4   :  { %16 = vsyncpa [#allocation4 + $0x1], 0 }
   0x5   :  { %17 = vsyncpa [#allocation5], 0 }
   0x6   :  { %19 = vsyncpa [#allocation5 + $0x1], 0  ;;  %s2271_s26 = smov 0   ;;  %s2273_s27 = smov 0  }
   0x7   :  { %s2275_s28 = smov 0   ;;  %s2277_s29 = smov 0  }
   0x8 LB: > { %s2292_s6 = sadd.s32 4294967295, %s2219_s29   ;;  %s1990_s30 = sadd.s32 4294967294, %s2219_s29   ;;  %s2219_s29 = sphi %s2277_s29, %s2977_s29   ;;  %s2215_s28 = sphi %s2275_s28, %s2976_s28   ;;  %s2211_s27 = sphi %s2273_s27, %s2975_s27   ;;  %s2207_s26 = sphi %s2271_s26, %s2974_s26  }
   0x9   : > { %s2296_s8 = sadd.s32 1, %s2219_s29   ;;  %s32_s9 = sadd.s32 1, %s2215_s28 }
   0xa   : > { %s29_s10 = ssub.s32 %s2219_s29, %s2296_s8  ;;  %p39_p0 = scmp.ne.s32.totalorder %s2215_s28, %s2211_s27 }
   0xb   : > { %p30_p1 = scmp.eq.s32.totalorder %s29_s10, 0  ;;  %p40_p2 = scmp.eq.s32.totalorder %s2219_s29, 0 }
   0xc   : > { %p45_p3 = scmp.ne.s32.totalorder %s2211_s27, %s2207_s26  ;;  %p46_p4 = scmp.eq.s32.totalorder %s2292_s6, 0 }
   0xd   : > { %s2308_s11 = scalar_select %p30_p1, %s2215_s28, %s32_s9  }
   0xe   : > { %p2310_p5 = por %p40_p2, %p39_p0  ;;  %p2314_p6 = por %p46_p4, %p45_p3 }
   0xf   : > { %p195_p7 = scmp.eq.s32.totalorder %s2292_s6, 1  ;;  %p201_p8 = scmp.eq.s32.totalorder %s1990_s30, 1 }
  0x10   : > { %p2078_p10 = scmp.lt.s32.totalorder %s2219_s29, 2  ;;  %s239_s16 = sand.u32 1, %s2215_s28  }
  0x11   : > { %p2321_p11 = por %p195_p7, %p39_p0  ;;  %p2325_p12 = por %p201_p8, %p45_p3 }
  0x12   : > { %s2064_s17 = sshll.u32 %s2219_s29, 10  ;;  %s1993_s18 = sshll.u32 %s239_s16, 7 }
  0x13   : > { %s2967_s14 = scalar_select %p2321_p11, 1, 0 }
  0x14   : > { %s2968_s15 = scalar_select %p2325_p12, 1, 0 }
  0x15   : > { %s2334_s21 = scalar_lea.hbm %s2956_s0, %s2064_s17  ;;  %s243_s22 = scalar_lea.vmem [#allocation3], %s1993_s18 }
  0x16   : > { %s250_s23 = sshll.u32 %s243_s22, 4  ;;  %p2338_p13 = pnand %p2078_p10, %p2310_p5  ;;  %s2342_s23 = int_to_ptr.vmem [resolvable:$true] %s250_s23 }
  0x17   : > { %s2345_s25 = scalar_lea.sflag [#allocation4], %s239_s16  ;;  %s2123_s30 = scalar_lea.hbm %s2334_s21, 2048 }
  0x18   : > { %p2124_p1 = scmp.ne.s32.totalorder %s2334_s21, %s2123_s30  ;;  %p2125_p2 = pneg %p2338_p13 }
  0x19   : > { %s2128_s12 = scalar_lea.hbm %s2956_s0, 4096  ;;  %p2129_p5 = scmp.lt.u32.totalorder %s2334_s21, %s2956_s0 }
  0x1a   : > { %p2126_p3 = pnand %p2125_p2, %p2124_p1  ;;  %p2130_p7 = scmp.lt.u32.totalorder %s2128_s12, %s2123_s30 }
  0x1b   : > { %p2132_p10 = scmp.lt.u32.totalorder %s2123_s30, %s2334_s21 }
  0x1c   : > { %p2127_p4 = pneg %p2126_p3  ;;  %p2131_p8 = por %p2130_p7, %p2129_p5 }
  0x1e   : > { %p2133_p9 = por %p2132_p10, %p2131_p8 }
  0x20   : > { %p2134_p0 = pnand %p2133_p9, %p2127_p4 }
  0x22   : > { %2137 = shalt.err (!%p2134_p0)
}
  0x23   : > { %s2138_s16 = scalar_lea.vmem %s2342_s23, 2048  ;;  %s2221_s19 = smov [#allocation3]  }
  0x24   : > { %p2139_p1 = scmp.ne.s32.totalorder %s2342_s23, %s2138_s16  ;;  %s2143_s20 = sshll.u32 %s2221_s19, 4  ;;  %s2144_s20 = int_to_ptr.vmem [resolvable:$false] %s2143_s20 }
  0x25   : > { %s2145_s22 = scalar_lea.vmem %s2144_s20, 4096  ;;  %p2146_p11 = scmp.lt.s32.totalorder %s2342_s23, %s2144_s20 }
  0x26   : > { %p2141_p3 = pnand %p2139_p1, %p2125_p2  ;;  %p2147_p5 = scmp.lt.s32.totalorder %s2145_s22, %s2138_s16 }
  0x28   : > { %p2142_p12 = pneg %p2141_p3  ;;  %p2148_p7 = por %p2147_p5, %p2146_p11 }
  0x2a   : > { %p2149_p8 = pnand %p2148_p7, %p2142_p12 }
  0x2c   : > { %2152 = shalt.err (!%p2149_p8)
}
  0x2d   : > { %s2222_s30 = smov 2048   ;;  %s2223_s9 = smov 1024  }
  0x2e   : > { %s2224_s10 = smov 64   ;;  %p258_p9 = scmp.lt.s32.totalorder %s2219_s29, 3 }
  0x2f   : > { %2073 = dma.hbm_to_vmem [thread:$0]  (!%p2338_p13), %s2334_s21, 2048, %s2342_s23, %s2345_s25, %s2222_s30, %s2223_s9, %s2224_s10  }
  0x30   : > { %p2970_p0 = scmp.ge.s32.totalorder %s2219_s29, 1 }
  0x32   : > { %p259_p2 = pnand %p2970_p0, %p258_p9 }
  0x33   : > { %s2377_s12 = sand.u32 (!%p259_p2), 1, %s2211_s27  }
  0x34   : > { %262 = sbr.rel (%p259_p2) target bundleno = 643 (0x283), region = 48  ;;  %s1997_s17 = sshll.u32 (!%p259_p2), %s2377_s12, 7 }
  0x35   : > { %s265_s18 = scalar_lea.sflag (!%p259_p2), [#allocation4], %s2377_s12  ;;  %s2381_s16 = scalar_lea.vmem (!%p259_p2), [#allocation3], %s1997_s17 }
  0x3b   : > { %2198 = dma.done.wait (%p2314_p6), %s265_s18, 2048  }
  0x3c   : > { %2200 = vsyncadd (%p2314_p6), %s265_s18, 4294965248  ;;  %v2225_v1 = vmov 0   ;;  %v306_v2 = vld [vmem:[%s2381_s16] sm:$0xff]  ;;  %vm427_vm0 = vcmask 1045504   ;;  %v307_v4 = vld [vmem:[%s2381_s16 + $0x8] sm:$0xff]  ;;  %vm420_vm1 = vcmask 97280  }
  0x3d   : > { %508 = vmatprep.mubr.bf16.mxu0 %v2225_v1  ;;  %561 = vmatprep.mubr.bf16.mxu1 %v2225_v1  ;;  %v314_v3 = vld [vmem:[%s2381_s16 + $0x40] sm:$0x33]  ;;  %v315_v6 = vld [vmem:[%s2381_s16 + $0x48] sm:$0x33]  ;;  %v308_v11 = vld [vmem:[%s2381_s16 + $0x10] sm:$0xff]  ;;  %vm1034_vm2 = vcmask 261120  }
  0x3e   : > { %2117 = vset.pattern.permute.xlu0 %v2225_v1  ;;  %2118 = vset.pattern.permute.xlu1 %v2225_v1  ;;  %v2002_v5 = vcombine.high %v306_v2, %v314_v3  ;;  %v2001_v7 = vcombine.low %v306_v2, %v314_v3  ;;  %v2004_v8 = vcombine.high %v307_v4, %v315_v6  ;;  %v2398_v10 = vld [vmem:[%s2957_s1] sm:$0xff]   ;;  %v316_v12 = vld [vmem:[%s2381_s16 + $0x50] sm:$0x33]  ;;  %v317_v16 = vld [vmem:[%s2381_s16 + $0x58] sm:$0x33]  ;;  %s2065_s20 = sshll.u32 %s2292_s6, 8 }
  0x3f   : > { %v2003_v9 = vcombine.low %v307_v4, %v315_v6  ;;  %v2006_v14 = vcombine.high %v308_v11, %v316_v12  ;;  %v309_v15 = vld [vmem:[%s2381_s16 + $0x18] sm:$0xff]  ;;  %v2005_v17 = vcombine.low %v308_v11, %v316_v12  ;;  %v310_v21 = vld [vmem:[%s2381_s16 + $0x20] sm:$0xff]  ;;  %v311_v24 = vld [vmem:[%s2381_s16 + $0x28] sm:$0xff]  ;;  %s2911_s10 = scalar_lea.hbm %s2963_s7, %s2065_s20  ;;  %s1906_s17 = scalar_lea.sflag [#allocation5], %s2377_s12 }
  0x40   : > { %2017 = vmatprep.subr.msk.bf16.mxu0 %vm427_vm0, %v2002_v5  ;;  %v429_v13 = vsel %vm427_vm0, %v2001_v7, 0  ;;  %2020 = vmatprep.subr.msk.bf16.mxu1 %vm427_vm0, %v2004_v8  ;;  %v2008_v19 = vcombine.high %v309_v15, %v317_v16  ;;  %v2007_v20 = vcombine.low %v309_v15, %v317_v16  ;;  %v318_v23 = vld [vmem:[%s2381_s16 + $0x60] sm:$0x33]  ;;  %v319_v25 = vld [vmem:[%s2381_s16 + $0x68] sm:$0x33]  ;;  %v324_v30 = vld [vmem:[%s2958_s2 + $0x10] sm:$0xff] }
  0x41   : > { %477 = vmatpush1.bf16.msra.mxu0 %v429_v13  ;;  %v435_v18 = vsel %vm427_vm0, %v2003_v9, 0  ;;  %v441_v22 = vsel %vm427_vm0, %v2005_v17, 0  ;;  %v2010_v27 = vcombine.high %v310_v21, %v318_v23  ;;  %v2012_v28 = vcombine.high %v311_v24, %v319_v25  ;;  %v322_v29 = vld [vmem:[%s2958_s2] sm:$0xff]  ;;  %v2432_v31 = vld [vmem:[%s2957_s1 + $0x8] sm:$0xff]   ;;  %338 = vperm.xlu1 %2118, %v324_v30   ;;  %v325_v33 = vld [vmem:[%s2958_s2 + $0x18] sm:$0xff]  ;;  %p2971_p11 = scmp.ne.s32.totalorder %s2967_s14, 0 }
  0x42   : > { %530 = vmatpush1.bf16.msra.mxu1 %v435_v18  ;;  %2023 = vmatprep.subr.msk.bf16.mxu0 %vm427_vm0, %v2006_v14  ;;  %v447_v26 = vsel %vm427_vm0, %v2007_v20, 0  ;;  %v323_v32 = vld [vmem:[%s2958_s2 + $0x8] sm:$0xff]  ;;  %v900_v34 = vld [vmem:[%s2960_s4] sm:$0xff]  ;;  %v2009_v35 = vcombine.low %v310_v21, %v318_v23  ;;  %v2011_v36 = vcombine.low %v311_v24, %v319_v25  ;;  %v312_v38 = vld [vmem:[%s2381_s16 + $0x30] sm:$0xff]  ;;  %s2227_s6 = smov [#allocation6]  }
  0x43   : > { %2026 = vmatprep.subr.msk.bf16.mxu1 %vm427_vm0, %v2008_v19  ;;  %328 = vperm.xlu0 %2117, %v322_v29   ;;  %v901_v37 = vld [vmem:[%s2960_s4 + $0x8] sm:$0xff]  ;;  %v320_v39 = vld [vmem:[%s2381_s16 + $0x70] sm:$0x33]  ;;  %v313_v40 = vld [vmem:[%s2381_s16 + $0x38] sm:$0xff]  ;;  %s2157_s13 = sshll.u32 %s2227_s6, 4  ;;  %s2158_s13 = int_to_ptr.vmem [resolvable:$false] %s2157_s13 }
  0x44   : > { %2018 = vmatmul.mubr.msk.bf16.vlgmr.msra.gmra.mrb[0].mxu0 %vm420_vm1, %v2398_v10  ;;  %v321_v41 = vld [vmem:[%s2381_s16 + $0x78] sm:$0x33]  ;;  %v902_v42 = vld [vmem:[%s2960_s4 + $0x10] sm:$0xff]  ;;  %v453_v43 = vsel %vm427_vm0, %v2009_v35, 0  ;;  %v459_v44 = vsel %vm427_vm0, %v2011_v36, 0  ;;  %v2014_v45 = vcombine.high %v312_v38, %v320_v39  ;;  %v1530_v47 = vld [vmem:[%s2961_s5] sm:$0xff]  ;;  %v2013_v52 = vcombine.low %v312_v38, %v320_v39 }
  0x45   : > { %2021 = vmatmul.mubr.msk.bf16.vlgmr.msra.gmra.mrb[0].mxu1 %vm420_vm1, %v2398_v10  ;;  %583 = vmatpush1.bf16.msra.mxu0 %v441_v22  ;;  %v2016_v46 = vcombine.high %v313_v40, %v321_v41  ;;  %v903_v48 = vld [vmem:[%s2960_s4 + $0x18] sm:$0xff]  ;;  %v1532_v49 = vld [vmem:[%s2961_s5 + $0x10] sm:$0xff]  ;;  %v1531_v50 = vld [vmem:[%s2961_s5 + $0x8] sm:$0xff]  ;;  %v2015_v53 = vcombine.low %v313_v40, %v321_v41  ;;  %s1998_s16 = sshll.u32 %s2377_s12, 4  ;;  %s2159_s21 = scalar_lea.vmem %s2158_s13, 512 }
  0x46   : > { %636 = vmatpush1.bf16.msra.mxu1 %v447_v26  ;;  %518 = vmatprep.mubr.bf16.mxu0 %v2225_v1  ;;  %v1465_v51 = vld [vmem:[#allocation2] sm:$0x1]  ;;  %v1533_v54 = vld [vmem:[%s2961_s5 + $0x18] sm:$0xff]  ;;  %v465_v55 = vsel %vm427_vm0, %v2013_v52, 0  ;;  %s2895_s19 = scalar_lea.vmem [#allocation6], %s1998_s16 }
  0x47   : > { %571 = vmatprep.mubr.bf16.mxu1 %v2225_v1  ;;  %2029 = vmatprep.subr.msk.bf16.mxu0 %vm427_vm0, %v2010_v27  ;;  %v471_v56 = vsel %vm427_vm0, %v2015_v53, 0  ;;  %s1920_s22 = sshll.u32 %s2895_s19, 4  ;;  %s2913_s22 = int_to_ptr.vmem [resolvable:$true] %s1920_s22 }
  0x48   : > { %2032 = vmatprep.subr.msk.bf16.mxu1 %vm427_vm0, %v2012_v28  ;;  %333 = vperm.xlu0 %2117, %v323_v32   ;;  %s2153_s18 = scalar_lea.vmem %s2913_s22, 256  ;;  %p2160_p4 = scmp.lt.s32.totalorder %s2913_s22, %s2158_s13 }
  0x49   : > { %343 = vperm.xlu1 %2118, %v325_v33   ;;  %p2154_p6 = scmp.ne.s32.totalorder %s2913_s22, %s2153_s18  ;;  %p2161_p10 = scmp.lt.s32.totalorder %s2159_s21, %s2153_s18 }
  0x4b   : > { %p2155_p12 = pnand %p2154_p6, %p2971_p11  ;;  %p2162_p1 = por %p2161_p10, %p2160_p4 }
  0x4c   : > { %2019 = vmatmul.mubr.msk.bf16.gmra.mrb[4].mxu0 %vm420_vm1, %v2432_v31  ;;  %1006 = vperm.xlu0 %2117, %v900_v34  }
  0x4d   : > { %2022 = vmatmul.mubr.msk.bf16.gmra.mrb[4].mxu1 %vm420_vm1, %v2432_v31  ;;  %614 = vmatprep.mubr.bf16.mxu0 %v2225_v1  ;;  %p2156_p13 = pneg %p2155_p12 }
  0x4e   : > { %667 = vmatprep.mubr.bf16.mxu1 %v2225_v1  ;;  %1011 = vperm.xlu1 %2118, %v901_v37  }
  0x4f   : > { %p2163_p3 = pnand %p2162_p1, %p2156_p13 }
  0x50   : > { %1016 = vperm.xlu0 %2117, %v902_v42  }
  0x52   : > { %1021 = vperm.xlu1 %2118, %v903_v48  }
  0x54   : > { %2024 = vmatmul.mubr.msk.bf16.vlgmr.msra.gmra.mrb[8].mxu0 %vm420_vm1, %v2398_v10  ;;  %1536 = vperm.xlu0 %2117, %v1530_v47  }
  0x55   : > { %2027 = vmatmul.mubr.msk.bf16.vlgmr.msra.gmra.mrb[8].mxu1 %vm420_vm1, %v2398_v10  ;;  %689 = vmatpush1.bf16.msra.mxu0 %v453_v43 }
  0x56   : > { %742 = vmatpush1.bf16.msra.mxu1 %v459_v44  ;;  %624 = vmatprep.mubr.bf16.mxu0 %v2225_v1 }
  0x57   : > { %677 = vmatprep.mubr.bf16.mxu1 %v2225_v1  ;;  %2035 = vmatprep.subr.msk.bf16.mxu0 %vm427_vm0, %v2014_v45 }
  0x58   : > { %2038 = vmatprep.subr.msk.bf16.mxu1 %vm427_vm0, %v2016_v46  ;;  %1546 = vperm.xlu0 %2117, %v1532_v49  }
  0x59   : > { %1541 = vperm.xlu1 %2118, %v1531_v50  }
  0x5c   : > { %2025 = vmatmul.mubr.msk.bf16.gmra.mrb[12].mxu0 %vm420_vm1, %v2432_v31  ;;  %1764 = vperm.xlu0 %2117, %v1465_v51  }
  0x5d   : > { %2028 = vmatmul.mubr.msk.bf16.gmra.mrb[12].mxu1 %vm420_vm1, %v2432_v31  ;;  %720 = vmatprep.mubr.bf16.mxu0 %v2225_v1 }
  0x5e   : > { %773 = vmatprep.mubr.bf16.mxu1 %v2225_v1  ;;  %1551 = vperm.xlu1 %2118, %v1533_v54  }
  0x64   : > { %2030 = vmatmul.mubr.msk.bf16.vlgmr.msra.gmra.mrb[16].mxu0 %vm420_vm1, %v2398_v10 }
  0x65   : > { %2033 = vmatmul.mubr.msk.bf16.vlgmr.msra.gmra.mrb[16].mxu1 %vm420_vm1, %v2398_v10  ;;  %795 = vmatpush1.bf16.msra.mxu0 %v465_v55 }
  0x66   : > { %848 = vmatpush1.bf16.msra.mxu1 %v471_v56  ;;  %730 = vmatprep.mubr.bf16.mxu0 %v2225_v1 }
  0x67   : > { %783 = vmatprep.mubr.bf16.mxu1 %v2225_v1 }
  0x6c   : > { %2031 = vmatmul.mubr.msk.bf16.gmra.mrb[20].mxu0 %vm420_vm1, %v2432_v31 }
  0x6d   : > { %2034 = vmatmul.mubr.msk.bf16.gmra.mrb[20].mxu1 %vm420_vm1, %v2432_v31  ;;  %826 = vmatprep.mubr.bf16.mxu0 %v2225_v1 }
  0x6e   : > { %879 = vmatprep.mubr.bf16.mxu1 %v2225_v1 }
  0x74   : > { %2036 = vmatmul.mubr.msk.bf16.vlgmr.msra.gmra.mrb[24].mxu0 %vm420_vm1, %v2398_v10 }
  0x75   : > { %2039 = vmatmul.mubr.msk.bf16.vlgmr.msra.gmra.mrb[24].mxu1 %vm420_vm1, %v2398_v10  ;;  %836 = vmatprep.mubr.bf16.mxu0 %v2225_v1 }
  0x76   : > { %889 = vmatprep.mubr.bf16.mxu1 %v2225_v1 }
  0x7c   : > { %2037 = vmatmul.mubr.msk.bf16.gmra.mrb[28].mxu0 %vm420_vm1, %v2432_v31 }
  0x7d   : > { %2040 = vmatmul.mubr.msk.bf16.gmra.mrb[28].mxu1 %vm420_vm1, %v2432_v31  ;;  %1073 = vmatprep.mubr.bf16.mxu0 %v2225_v1 }
  0x7e   : > { %1126 = vmatprep.mubr.bf16.mxu1 %v2225_v1 }
  0xc0   : > { %v2519_v58 = vpop.permute.xlu1 %338 }
  0xc2   : > { %v2517_v57 = vpop.permute.xlu0 %328 }
  0xc7   : > { %v2521_v59 = vpop.permute.xlu0 %333 }
  0xc8   : > { %v2531_v22 = vpop.permute.xlu1 %343 }
 0x117   : > { %v510_v60 = vpop.f32.mrb[0].mxu0 }
 0x118   : > { %v511_v61 = vadd.f32 %v510_v60, %v2517_v57  ;;  %v563_v62 = vpop.f32.mrb[0].mxu1  ;;  %v512_v63 = vpop.f32.mrb[1].mxu0 }
 0x119   : > { %v564_v0 = vadd.f32 %v563_v62, %v2517_v57  ;;  %v513_v2 = vadd.f32 %v512_v63, %v2517_v57  ;;  %v565_v3 = vpop.f32.mrb[1].mxu1  ;;  %v514_v4 = vpop.f32.mrb[2].mxu0 }
 0x11a   : > { %v566_v5 = vadd.f32 %v565_v3, %v2517_v57  ;;  %v515_v6 = vadd.f32 %v514_v4, %v2521_v59  ;;  %v567_v7 = vpop.f32.mrb[2].mxu1  ;;  %v516_v8 = vpop.f32.mrb[3].mxu0  ;;  %v904_v12 = vmax.f32 %v511_v61, 0.0 }
 0x11b   : > { %v568_v9 = vadd.f32 %v567_v7, %v2521_v59  ;;  %v517_v10 = vadd.f32 %v516_v8, %v2521_v59  ;;  %v569_v11 = vpop.f32.mrb[3].mxu1  ;;  %v906_v15 = vmax.f32 %v564_v0, 0.0  ;;  %v905_v16 = vmax.f32 %v513_v2, 0.0  ;;  %v2547_v2 = vld [vmem:[%s2959_s3] sm:$0xff]  }
 0x11c   : > { %v920_v13 = vmax.f32 %v515_v6, 0.0  ;;  %v570_v14 = vadd.f32 %v569_v11, %v2521_v59  ;;  %v907_v19 = vmax.f32 %v566_v5, 0.0 }
 0x11d   : > { %v922_v17 = vmax.f32 %v568_v9, 0.0  ;;  %v921_v18 = vmax.f32 %v517_v10, 0.0 }
 0x11e   : > { %v972_v20 = vpack.c.bf16 %v920_v13, %v904_v12  ;;  %v923_v21 = vmax.f32 %v570_v14, 0.0 }
 0x11f   : > { %v974_v23 = vpack.c.bf16 %v922_v17, %v906_v15  ;;  %v973_v24 = vpack.c.bf16 %v921_v18, %v905_v16  ;;  %v520_v25 = vpop.f32.mrb[4].mxu0 }
 0x120   : > { %v975_v26 = vpack.c.bf16 %v923_v21, %v907_v19  ;;  %v521_v27 = vadd.f32 %v520_v25, %v2519_v58  ;;  %v573_v28 = vpop.f32.mrb[4].mxu1  ;;  %v522_v29 = vpop.f32.mrb[5].mxu0 }
 0x121   : > { %v574_v30 = vadd.f32 %v573_v28, %v2519_v58  ;;  %v523_v31 = vadd.f32 %v522_v29, %v2519_v58  ;;  %v575_v32 = vpop.f32.mrb[5].mxu1  ;;  %v524_v33 = vpop.f32.mrb[6].mxu0  ;;  %1041 = vmatprep.subr.bf16.mxu0 %v973_v24 }
 0x122   : > { %v576_v34 = vadd.f32 %v575_v32, %v2519_v58  ;;  %v525_v35 = vadd.f32 %v524_v33, %v2531_v22  ;;  %v577_v36 = vpop.f32.mrb[6].mxu1  ;;  %1094 = vmatprep.subr.bf16.mxu1 %v975_v26  ;;  %v526_v37 = vpop.f32.mrb[7].mxu0  ;;  %1042 = vmatpush1.bf16.msra.mxu0 %v972_v20  ;;  %v936_v41 = vmax.f32 %v521_v27, 0.0  ;;  %v2566_v32 = vld [vmem:[%s2959_s3 + $0x8] sm:$0xff]  }
 0x123   : > { %v578_v38 = vadd.f32 %v577_v36, %v2531_v22  ;;  %v527_v39 = vadd.f32 %v526_v37, %v2531_v22  ;;  %v579_v40 = vpop.f32.mrb[7].mxu1  ;;  %1095 = vmatpush1.bf16.msra.mxu1 %v974_v23  ;;  %v938_v44 = vmax.f32 %v574_v30, 0.0  ;;  %v937_v45 = vmax.f32 %v523_v31, 0.0 }
 0x124   : > { %v952_v42 = vmax.f32 %v525_v35, 0.0  ;;  %v580_v43 = vadd.f32 %v579_v40, %v2531_v22  ;;  %v939_v48 = vmax.f32 %v576_v34, 0.0 }
 0x125   : > { %v954_v46 = vmax.f32 %v578_v38, 0.0  ;;  %v953_v47 = vmax.f32 %v527_v39, 0.0 }
 0x126   : > { %v988_v49 = vpack.c.bf16 %v952_v42, %v936_v41  ;;  %v955_v50 = vmax.f32 %v580_v43, 0.0 }
 0x127   : > { %v990_v51 = vpack.c.bf16 %v954_v46, %v938_v44  ;;  %v989_v52 = vpack.c.bf16 %v953_v47, %v937_v45  ;;  %v616_v53 = vpop.f32.mrb[8].mxu0 }
 0x128   : > { %v991_v54 = vpack.c.bf16 %v955_v50, %v939_v48  ;;  %v617_v55 = vadd.f32 %v616_v53, %v2517_v57  ;;  %v669_v56 = vpop.f32.mrb[8].mxu1  ;;  %v618_v60 = vpop.f32.mrb[9].mxu0 }
 0x129   : > { %v670_v61 = vadd.f32 %v669_v56, %v2517_v57  ;;  %v619_v62 = vadd.f32 %v618_v60, %v2517_v57  ;;  %v671_v63 = vpop.f32.mrb[9].mxu1  ;;  %v620_v0 = vpop.f32.mrb[10].mxu0  ;;  %1043 = vmatprep.subr.bf16.mxu0 %v989_v52 }
 0x12a   : > { %v672_v3 = vadd.f32 %v671_v63, %v2517_v57  ;;  %v621_v4 = vadd.f32 %v620_v0, %v2521_v59  ;;  %v673_v5 = vpop.f32.mrb[10].mxu1  ;;  %1096 = vmatprep.subr.bf16.mxu1 %v991_v54  ;;  %v622_v6 = vpop.f32.mrb[11].mxu0  ;;  %1044 = vmatpush1.bf16.msra.mxu0 %v988_v49  ;;  %v908_v10 = vmax.f32 %v617_v55, 0.0 }
 0x12b   : > { %v674_v7 = vadd.f32 %v673_v5, %v2521_v59  ;;  %v623_v8 = vadd.f32 %v622_v6, %v2521_v59  ;;  %v675_v9 = vpop.f32.mrb[11].mxu1  ;;  %1097 = vmatpush1.bf16.msra.mxu1 %v990_v51  ;;  %v910_v13 = vmax.f32 %v670_v61, 0.0  ;;  %v909_v14 = vmax.f32 %v619_v62, 0.0 }
 0x12c   : > { %v924_v11 = vmax.f32 %v621_v4, 0.0  ;;  %v676_v12 = vadd.f32 %v675_v9, %v2521_v59  ;;  %v911_v17 = vmax.f32 %v672_v3, 0.0 }
 0x12d   : > { %v926_v15 = vmax.f32 %v674_v7, 0.0  ;;  %v925_v16 = vmax.f32 %v623_v8, 0.0  ;;  %2043 = vmatmul.mubr.msk.bf16.vlgmr.msra.gmra.mrb[32].mxu0 %vm1034_vm2, %v2547_v2 }
 0x12e   : > { %v976_v18 = vpack.c.bf16 %v924_v11, %v908_v10  ;;  %v927_v19 = vmax.f32 %v676_v12, 0.0  ;;  %2045 = vmatmul.mubr.msk.bf16.vlgmr.msra.gmra.mrb[32].mxu1 %vm1034_vm2, %v2547_v2  ;;  %1083 = vmatprep.mubr.bf16.mxu0 %v2225_v1 }
 0x12f   : > { %v978_v20 = vpack.c.bf16 %v926_v15, %v910_v13  ;;  %v977_v21 = vpack.c.bf16 %v925_v16, %v909_v14  ;;  %v626_v23 = vpop.f32.mrb[12].mxu0  ;;  %1136 = vmatprep.mubr.bf16.mxu1 %v2225_v1 }
 0x130   : > { %v979_v24 = vpack.c.bf16 %v927_v19, %v911_v17  ;;  %v627_v25 = vadd.f32 %v626_v23, %v2519_v58  ;;  %v679_v26 = vpop.f32.mrb[12].mxu1  ;;  %v628_v27 = vpop.f32.mrb[13].mxu0 }
 0x131   : > { %v680_v28 = vadd.f32 %v679_v26, %v2519_v58  ;;  %v629_v29 = vadd.f32 %v628_v27, %v2519_v58  ;;  %v681_v30 = vpop.f32.mrb[13].mxu1  ;;  %v630_v31 = vpop.f32.mrb[14].mxu0  ;;  %1147 = vmatprep.subr.bf16.mxu0 %v977_v21 }
 0x132   : > { %v682_v33 = vadd.f32 %v681_v30, %v2519_v58  ;;  %v631_v34 = vadd.f32 %v630_v31, %v2531_v22  ;;  %v683_v35 = vpop.f32.mrb[14].mxu1  ;;  %1200 = vmatprep.subr.bf16.mxu1 %v979_v24  ;;  %v632_v36 = vpop.f32.mrb[15].mxu0  ;;  %1148 = vmatpush1.bf16.msra.mxu0 %v976_v18  ;;  %v940_v40 = vmax.f32 %v627_v25, 0.0 }
 0x133   : > { %v684_v37 = vadd.f32 %v683_v35, %v2531_v22  ;;  %v633_v38 = vadd.f32 %v632_v36, %v2531_v22  ;;  %v685_v39 = vpop.f32.mrb[15].mxu1  ;;  %1201 = vmatpush1.bf16.msra.mxu1 %v978_v20  ;;  %v942_v43 = vmax.f32 %v680_v28, 0.0  ;;  %v941_v44 = vmax.f32 %v629_v29, 0.0 }
 0x134   : > { %v956_v41 = vmax.f32 %v631_v34, 0.0  ;;  %v686_v42 = vadd.f32 %v685_v39, %v2531_v22  ;;  %v943_v47 = vmax.f32 %v682_v33, 0.0 }
 0x135   : > { %v958_v45 = vmax.f32 %v684_v37, 0.0  ;;  %v957_v46 = vmax.f32 %v633_v38, 0.0  ;;  %2044 = vmatmul.mubr.msk.bf16.gmra.mrb[36].mxu0 %vm1034_vm2, %v2566_v32 }
 0x136   : > { %v992_v48 = vpack.c.bf16 %v956_v41, %v940_v40  ;;  %v959_v49 = vmax.f32 %v686_v42, 0.0  ;;  %2046 = vmatmul.mubr.msk.bf16.gmra.mrb[36].mxu1 %vm1034_vm2, %v2566_v32  ;;  %1179 = vmatprep.mubr.bf16.mxu0 %v2225_v1 }
 0x137   : > { %v994_v50 = vpack.c.bf16 %v958_v45, %v942_v43  ;;  %v993_v51 = vpack.c.bf16 %v957_v46, %v941_v44  ;;  %v722_v52 = vpop.f32.mrb[16].mxu0  ;;  %1232 = vmatprep.mubr.bf16.mxu1 %v2225_v1 }
 0x138   : > { %v995_v53 = vpack.c.bf16 %v959_v49, %v943_v47  ;;  %v723_v54 = vadd.f32 %v722_v52, %v2517_v57  ;;  %v775_v55 = vpop.f32.mrb[16].mxu1  ;;  %v724_v56 = vpop.f32.mrb[17].mxu0 }
 0x139   : > { %v776_v60 = vadd.f32 %v775_v55, %v2517_v57  ;;  %v725_v61 = vadd.f32 %v724_v56, %v2517_v57  ;;  %v777_v62 = vpop.f32.mrb[17].mxu1  ;;  %v726_v63 = vpop.f32.mrb[18].mxu0  ;;  %1149 = vmatprep.subr.bf16.mxu0 %v993_v51 }
 0x13a   : > { %v778_v0 = vadd.f32 %v777_v62, %v2517_v57  ;;  %v727_v3 = vadd.f32 %v726_v63, %v2521_v59  ;;  %v779_v4 = vpop.f32.mrb[18].mxu1  ;;  %1202 = vmatprep.subr.bf16.mxu1 %v995_v53  ;;  %v728_v5 = vpop.f32.mrb[19].mxu0  ;;  %1150 = vmatpush1.bf16.msra.mxu0 %v992_v48  ;;  %v912_v9 = vmax.f32 %v723_v54, 0.0 }
 0x13b   : > { %v780_v6 = vadd.f32 %v779_v4, %v2521_v59  ;;  %v729_v7 = vadd.f32 %v728_v5, %v2521_v59  ;;  %v781_v8 = vpop.f32.mrb[19].mxu1  ;;  %1203 = vmatpush1.bf16.msra.mxu1 %v994_v50  ;;  %v914_v12 = vmax.f32 %v776_v60, 0.0  ;;  %v913_v13 = vmax.f32 %v725_v61, 0.0 }
 0x13c   : > { %v928_v10 = vmax.f32 %v727_v3, 0.0  ;;  %v782_v11 = vadd.f32 %v781_v8, %v2521_v59  ;;  %v915_v16 = vmax.f32 %v778_v0, 0.0 }
 0x13d   : > { %v930_v14 = vmax.f32 %v780_v6, 0.0  ;;  %v929_v15 = vmax.f32 %v729_v7, 0.0  ;;  %2047 = vmatmul.mubr.msk.bf16.vlgmr.msra.gmra.mrb[40].mxu0 %vm1034_vm2, %v2547_v2 }
 0x13e   : > { %v980_v17 = vpack.c.bf16 %v928_v10, %v912_v9  ;;  %v931_v18 = vmax.f32 %v782_v11, 0.0  ;;  %2049 = vmatmul.mubr.msk.bf16.vlgmr.msra.gmra.mrb[40].mxu1 %vm1034_vm2, %v2547_v2  ;;  %1189 = vmatprep.mubr.bf16.mxu0 %v2225_v1 }
 0x13f   : > { %v982_v19 = vpack.c.bf16 %v930_v14, %v914_v12  ;;  %v981_v20 = vpack.c.bf16 %v929_v15, %v913_v13  ;;  %v732_v21 = vpop.f32.mrb[20].mxu0  ;;  %1242 = vmatprep.mubr.bf16.mxu1 %v2225_v1 }
 0x140   : > { %v983_v23 = vpack.c.bf16 %v931_v18, %v915_v16  ;;  %v733_v24 = vadd.f32 %v732_v21, %v2519_v58  ;;  %v785_v25 = vpop.f32.mrb[20].mxu1  ;;  %v734_v26 = vpop.f32.mrb[21].mxu0 }
 0x141   : > { %v786_v27 = vadd.f32 %v785_v25, %v2519_v58  ;;  %v735_v28 = vadd.f32 %v734_v26, %v2519_v58  ;;  %v787_v29 = vpop.f32.mrb[21].mxu1  ;;  %v736_v30 = vpop.f32.mrb[22].mxu0  ;;  %1253 = vmatprep.subr.bf16.mxu0 %v981_v20 }
 0x142   : > { %v788_v31 = vadd.f32 %v787_v29, %v2519_v58  ;;  %v737_v33 = vadd.f32 %v736_v30, %v2531_v22  ;;  %v789_v34 = vpop.f32.mrb[22].mxu1  ;;  %1306 = vmatprep.subr.bf16.mxu1 %v983_v23  ;;  %v738_v35 = vpop.f32.mrb[23].mxu0  ;;  %1254 = vmatpush1.bf16.msra.mxu0 %v980_v17  ;;  %v944_v39 = vmax.f32 %v733_v24, 0.0 }
 0x143   : > { %v790_v36 = vadd.f32 %v789_v34, %v2531_v22  ;;  %v739_v37 = vadd.f32 %v738_v35, %v2531_v22  ;;  %v791_v38 = vpop.f32.mrb[23].mxu1  ;;  %1307 = vmatpush1.bf16.msra.mxu1 %v982_v19  ;;  %v946_v42 = vmax.f32 %v786_v27, 0.0  ;;  %v945_v43 = vmax.f32 %v735_v28, 0.0 }
 0x144   : > { %v960_v40 = vmax.f32 %v737_v33, 0.0  ;;  %v792_v41 = vadd.f32 %v791_v38, %v2531_v22  ;;  %v947_v46 = vmax.f32 %v788_v31, 0.0 }
 0x145   : > { %v962_v44 = vmax.f32 %v790_v36, 0.0  ;;  %v961_v45 = vmax.f32 %v739_v37, 0.0  ;;  %2048 = vmatmul.mubr.msk.bf16.gmra.mrb[44].mxu0 %vm1034_vm2, %v2566_v32 }
 0x146   : > { %v996_v47 = vpack.c.bf16 %v960_v40, %v944_v39  ;;  %v963_v48 = vmax.f32 %v792_v41, 0.0  ;;  %2050 = vmatmul.mubr.msk.bf16.gmra.mrb[44].mxu1 %vm1034_vm2, %v2566_v32  ;;  %1285 = vmatprep.mubr.bf16.mxu0 %v2225_v1 }
 0x147   : > { %v998_v49 = vpack.c.bf16 %v962_v44, %v946_v42  ;;  %v997_v50 = vpack.c.bf16 %v961_v45, %v945_v43  ;;  %v828_v51 = vpop.f32.mrb[24].mxu0  ;;  %1338 = vmatprep.mubr.bf16.mxu1 %v2225_v1 }
 0x148   : > { %v999_v52 = vpack.c.bf16 %v963_v48, %v947_v46  ;;  %v829_v53 = vadd.f32 %v828_v51, %v2517_v57  ;;  %v881_v54 = vpop.f32.mrb[24].mxu1  ;;  %v830_v55 = vpop.f32.mrb[25].mxu0  ;;  %v1767_v51 = vlaneseq }
 0x149   : > { %v882_v56 = vadd.f32 %v881_v54, %v2517_v57  ;;  %v831_v60 = vadd.f32 %v830_v55, %v2517_v57  ;;  %v883_v61 = vpop.f32.mrb[25].mxu1  ;;  %v832_v62 = vpop.f32.mrb[26].mxu0  ;;  %1255 = vmatprep.subr.bf16.mxu0 %v997_v50 }
 0x14a   : > { %v884_v63 = vadd.f32 %v883_v61, %v2517_v57  ;;  %v833_v0 = vadd.f32 %v832_v62, %v2521_v59  ;;  %v885_v3 = vpop.f32.mrb[26].mxu1  ;;  %1308 = vmatprep.subr.bf16.mxu1 %v999_v52  ;;  %v834_v4 = vpop.f32.mrb[27].mxu0  ;;  %1256 = vmatpush1.bf16.msra.mxu0 %v996_v47  ;;  %v916_v8 = vmax.f32 %v829_v53, 0.0  ;;  %v2226_v52 = vmov 1966171168  }
 0x14b   : > { %v886_v5 = vadd.f32 %v885_v3, %v2521_v59  ;;  %v835_v6 = vadd.f32 %v834_v4, %v2521_v59  ;;  %v887_v7 = vpop.f32.mrb[27].mxu1  ;;  %1309 = vmatpush1.bf16.msra.mxu1 %v998_v49  ;;  %v918_v11 = vmax.f32 %v882_v56, 0.0  ;;  %v917_v12 = vmax.f32 %v831_v60, 0.0  ;;  %v2645_v47 = vpop.permute.xlu0 %1006 }
 0x14c   : > { %v932_v9 = vmax.f32 %v833_v0, 0.0  ;;  %v888_v10 = vadd.f32 %v887_v7, %v2521_v59  ;;  %v919_v14 = vmax.f32 %v884_v63, 0.0  ;;  %v2651_v50 = vpop.permute.xlu1 %1011  ;;  %v1808_v53 = vunpack.c.l.s4 %v2226_v52 }
 0x14d   : > { %v934_v13 = vmax.f32 %v886_v5, 0.0  ;;  %v933_v57 = vmax.f32 %v835_v6, 0.0  ;;  %2051 = vmatmul.mubr.msk.bf16.vlgmr.msra.gmra.mrb[48].mxu0 %vm1034_vm2, %v2547_v2 }
 0x14e   : > { %v984_v15 = vpack.c.bf16 %v932_v9, %v916_v8  ;;  %v935_v16 = vmax.f32 %v888_v10, 0.0  ;;  %2053 = vmatmul.mubr.msk.bf16.vlgmr.msra.gmra.mrb[48].mxu1 %vm1034_vm2, %v2547_v2  ;;  %1295 = vmatprep.mubr.bf16.mxu0 %v2225_v1  ;;  %v1809_v61 = vunpack.c.0.s8 %v1808_v53 }
 0x14f   : > { %v986_v17 = vpack.c.bf16 %v934_v13, %v918_v11  ;;  %v985_v18 = vpack.c.bf16 %v933_v57, %v917_v12  ;;  %v838_v19 = vpop.f32.mrb[28].mxu0  ;;  %1348 = vmatprep.mubr.bf16.mxu1 %v2225_v1  ;;  %v2647_v48 = vpop.permute.xlu0 %1016 }
 0x150   : > { %v987_v59 = vpack.c.bf16 %v935_v16, %v919_v14  ;;  %v839_v20 = vadd.f32 %v838_v19, %v2519_v58  ;;  %v891_v21 = vpop.f32.mrb[28].mxu1  ;;  %v840_v23 = vpop.f32.mrb[29].mxu0 }
 0x151   : > { %v892_v24 = vadd.f32 %v891_v21, %v2519_v58  ;;  %v841_v25 = vadd.f32 %v840_v23, %v2519_v58  ;;  %v893_v26 = vpop.f32.mrb[29].mxu1  ;;  %v842_v27 = vpop.f32.mrb[30].mxu0  ;;  %1359 = vmatprep.subr.bf16.mxu0 %v985_v18 }
 0x152   : > { %v894_v28 = vadd.f32 %v893_v26, %v2519_v58  ;;  %v843_v29 = vadd.f32 %v842_v27, %v2531_v22  ;;  %v895_v30 = vpop.f32.mrb[30].mxu1  ;;  %1412 = vmatprep.subr.bf16.mxu1 %v987_v59  ;;  %v844_v31 = vpop.f32.mrb[31].mxu0  ;;  %1360 = vmatpush1.bf16.msra.mxu0 %v984_v15  ;;  %v948_v36 = vmax.f32 %v839_v20, 0.0 }
 0x153   : > { %v896_v33 = vadd.f32 %v895_v30, %v2531_v22  ;;  %v845_v34 = vadd.f32 %v844_v31, %v2531_v22  ;;  %v897_v35 = vpop.f32.mrb[31].mxu1  ;;  %1413 = vmatpush1.bf16.msra.mxu1 %v986_v17  ;;  %v950_v39 = vmax.f32 %v892_v24, 0.0  ;;  %v949_v40 = vmax.f32 %v841_v25, 0.0  ;;  %v2649_v49 = vpop.permute.xlu0 %1536 }
 0x154   : > { %v964_v37 = vmax.f32 %v843_v29, 0.0  ;;  %v898_v38 = vadd.f32 %v897_v35, %v2531_v22  ;;  %v951_v42 = vmax.f32 %v894_v28, 0.0  ;;  %v2655_v54 = vpop.permute.xlu1 %1021 }
 0x155   : > { %v966_v41 = vmax.f32 %v896_v33, 0.0  ;;  %v965_v58 = vmax.f32 %v845_v34, 0.0  ;;  %2052 = vmatmul.mubr.msk.bf16.gmra.mrb[52].mxu0 %vm1034_vm2, %v2566_v32 }
 0x156   : > { %v1000_v43 = vpack.c.bf16 %v964_v37, %v948_v36  ;;  %v967_v44 = vmax.f32 %v898_v38, 0.0  ;;  %2054 = vmatmul.mubr.msk.bf16.gmra.mrb[52].mxu1 %vm1034_vm2, %v2566_v32  ;;  %1391 = vmatprep.mubr.bf16.mxu0 %v2225_v1 }
 0x157   : > { %v1002_v45 = vpack.c.bf16 %v966_v41, %v950_v39  ;;  %v1001_v46 = vpack.c.bf16 %v965_v58, %v949_v40  ;;  %1444 = vmatprep.mubr.bf16.mxu1 %v2225_v1 }
 0x158   : > { %v1003_v22 = vpack.c.bf16 %v967_v44, %v951_v42  ;;  %v2667_v19 = vpop.permute.xlu1 %1541 }
 0x159   : > { %1361 = vmatprep.subr.bf16.mxu0 %v1001_v46 }
 0x15a   : > { %1414 = vmatprep.subr.bf16.mxu1 %v1003_v22  ;;  %1362 = vmatpush1.bf16.msra.mxu0 %v1000_v43 }
 0x15b   : > { %1415 = vmatpush1.bf16.msra.mxu1 %v1002_v45 }
 0x15d   : > { %2055 = vmatmul.mubr.msk.bf16.vlgmr.msra.gmra.mrb[56].mxu0 %vm1034_vm2, %v2547_v2 }
 0x15e   : > { %2057 = vmatmul.mubr.msk.bf16.vlgmr.msra.gmra.mrb[56].mxu1 %vm1034_vm2, %v2547_v2  ;;  %1401 = vmatprep.mubr.bf16.mxu0 %v2225_v1  ;;  %v2653_v2 = vpop.permute.xlu0 %1546 }
 0x15f   : > { %1454 = vmatprep.mubr.bf16.mxu1 %v2225_v1  ;;  %v1768_v1 = vshrl.u32 %v1767_v51, 7 }
 0x161   : > { %v1769_v4 = vsub.s32 0, %v1768_v1  ;;  %v2665_v18 = vsub.s32 %v1809_v61, %v1768_v1 }
 0x162   : > { %v1765_v10 = vpop.permute.xlu0 %1764 }
 0x163   : > { %v2669_v21 = vrot.slane %v1765_v10, %v1769_v4 }
 0x165   : > { %2056 = vmatmul.mubr.msk.bf16.gmra.mrb[60].mxu0 %vm1034_vm2, %v2566_v32 }
 0x166   : > { %2058 = vmatmul.mubr.msk.bf16.gmra.mrb[60].mxu1 %vm1034_vm2, %v2566_v32 }
 0x200   : > { %v1075_v55 = vpop.f32.mrb[32].mxu0 }
 0x201   : > { %v1076_v56 = vadd.f32 %v1075_v55, %v2645_v47  ;;  %v1128_v32 = vpop.f32.mrb[32].mxu1  ;;  %v1077_v60 = vpop.f32.mrb[33].mxu0 }
 0x202   : > { %v1129_v62 = vadd.f32 %v1128_v32, %v2645_v47  ;;  %v1078_v63 = vadd.f32 %v1077_v60, %v2645_v47  ;;  %v1130_v0 = vpop.f32.mrb[33].mxu1  ;;  %v1079_v3 = vpop.f32.mrb[34].mxu0 }
 0x203   : > { %v1466_v5 = vmax.f32 %v1076_v56, 0.0  ;;  %v1131_v6 = vadd.f32 %v1130_v0, %v2645_v47  ;;  %v1080_v7 = vadd.f32 %v1079_v3, %v2651_v50  ;;  %v1132_v8 = vpop.f32.mrb[34].mxu1  ;;  %v1081_v9 = vpop.f32.mrb[35].mxu0 }
 0x204   : > { %v1468_v11 = vmax.f32 %v1129_v62, 0.0  ;;  %v1467_v12 = vmax.f32 %v1078_v63, 0.0  ;;  %v1133_v13 = vadd.f32 %v1132_v8, %v2651_v50  ;;  %v1082_v57 = vadd.f32 %v1081_v9, %v2651_v50  ;;  %v1134_v14 = vpop.f32.mrb[35].mxu1  ;;  %v2688_v63 = vpop.permute.xlu1 %1551 }
 0x205   : > { %v1469_v15 = vmax.f32 %v1131_v6, 0.0  ;;  %v1482_v16 = vmax.f32 %v1080_v7, 0.0  ;;  %v1135_v17 = vadd.f32 %v1134_v14, %v2651_v50  ;;  %v1554_v23 = vmul.f32 %v2649_v49, %v1466_v5 }
 0x206   : > { %v1484_v59 = vmax.f32 %v1133_v13, 0.0  ;;  %v1483_v20 = vmax.f32 %v1082_v57, 0.0  ;;  %v1556_v26 = vmul.f32 %v2649_v49, %v1468_v11  ;;  %v1555_v27 = vmul.f32 %v2649_v49, %v1467_v12 }
 0x207   : > { %v1570_v24 = vmul.f32 %v2667_v19, %v1482_v16  ;;  %v1485_v25 = vmax.f32 %v1135_v17, 0.0  ;;  %v1557_v31 = vmul.f32 %v2649_v49, %v1469_v15 }
 0x208   : > { %v1572_v28 = vmul.f32 %v2667_v19, %v1484_v59  ;;  %v1571_v29 = vmul.f32 %v2667_v19, %v1483_v20  ;;  %v1085_v30 = vpop.f32.mrb[36].mxu0 }
 0x209   : > { %v1618_v33 = vadd.f32 %v1570_v24, %v1554_v23  ;;  %v1573_v34 = vmul.f32 %v2667_v19, %v1485_v25  ;;  %v1086_v35 = vadd.f32 %v1085_v30, %v2647_v48  ;;  %v1138_v36 = vpop.f32.mrb[36].mxu1  ;;  %v1087_v37 = vpop.f32.mrb[37].mxu0 }
 0x20a   : > { %v1636_v38 = vadd.f32 %v1572_v28, %v1556_v26  ;;  %v1627_v39 = vadd.f32 %v1571_v29, %v1555_v27  ;;  %v1139_v40 = vadd.f32 %v1138_v36, %v2647_v48  ;;  %v1088_v41 = vadd.f32 %v1087_v37, %v2647_v48  ;;  %v1140_v58 = vpop.f32.mrb[37].mxu1  ;;  %v1089_v42 = vpop.f32.mrb[38].mxu0 }
 0x20b   : > { %v1645_v43 = vadd.f32 %v1573_v34, %v1557_v31  ;;  %v1498_v44 = vmax.f32 %v1086_v35, 0.0  ;;  %v1141_v45 = vadd.f32 %v1140_v58, %v2647_v48  ;;  %v1090_v46 = vadd.f32 %v1089_v42, %v2655_v54  ;;  %v1142_v22 = vpop.f32.mrb[38].mxu1  ;;  %v1091_v51 = vpop.f32.mrb[39].mxu0 }
 0x20c   : > { %v1500_v52 = vmax.f32 %v1139_v40, 0.0  ;;  %v1499_v53 = vmax.f32 %v1088_v41, 0.0  ;;  %v1143_v1 = vadd.f32 %v1142_v22, %v2655_v54  ;;  %v1092_v55 = vadd.f32 %v1091_v51, %v2655_v54  ;;  %v1144_v56 = vpop.f32.mrb[39].mxu1 }
 0x20d   : > { %v1586_v32 = vmul.f32 %v2653_v2, %v1498_v44  ;;  %v1501_v60 = vmax.f32 %v1141_v45, 0.0  ;;  %v1514_v61 = vmax.f32 %v1090_v46, 0.0  ;;  %v1145_v62 = vadd.f32 %v1144_v56, %v2655_v54 }
 0x20e   : > { %v1588_v0 = vmul.f32 %v2653_v2, %v1500_v52  ;;  %v1587_v3 = vmul.f32 %v2653_v2, %v1499_v53  ;;  %v1516_v4 = vmax.f32 %v1143_v1, 0.0  ;;  %v1515_v5 = vmax.f32 %v1092_v55, 0.0 }
 0x20f   : > { %v1619_v6 = vadd.f32 %v1618_v33, %v1586_v32  ;;  %v1589_v7 = vmul.f32 %v2653_v2, %v1501_v60  ;;  %v1602_v8 = vmul.f32 %v2688_v63, %v1514_v61  ;;  %v1517_v9 = vmax.f32 %v1145_v62, 0.0 }
 0x210   : > { %v1637_v10 = vadd.f32 %v1636_v38, %v1588_v0  ;;  %v1628_v11 = vadd.f32 %v1627_v39, %v1587_v3  ;;  %v1604_v12 = vmul.f32 %v2688_v63, %v1516_v4  ;;  %v1603_v13 = vmul.f32 %v2688_v63, %v1515_v5  ;;  %v1181_v57 = vpop.f32.mrb[40].mxu0 }
 0x211   : > { %v1646_v14 = vadd.f32 %v1645_v43, %v1589_v7  ;;  %v1620_v15 = vadd.f32 %v1619_v6, %v1602_v8  ;;  %v1605_v16 = vmul.f32 %v2688_v63, %v1517_v9  ;;  %v1182_v17 = vadd.f32 %v1181_v57, %v2645_v47  ;;  %v1234_v59 = vpop.f32.mrb[40].mxu1  ;;  %v1183_v20 = vpop.f32.mrb[41].mxu0 }
 0x212   : > { %v1638_v23 = vadd.f32 %v1637_v10, %v1604_v12  ;;  %v1629_v24 = vadd.f32 %v1628_v11, %v1603_v13  ;;  %v1235_v25 = vadd.f32 %v1234_v59, %v2645_v47  ;;  %v1184_v26 = vadd.f32 %v1183_v20, %v2645_v47  ;;  %v1236_v27 = vpop.f32.mrb[41].mxu1  ;;  %v1185_v28 = vpop.f32.mrb[42].mxu0 }
 0x213   : > { %v1621_v29 = vrot.slane %v1620_v15, 4  ;;  %v1647_v30 = vadd.f32 %v1646_v14, %v1605_v16  ;;  %v1470_v31 = vmax.f32 %v1182_v17, 0.0  ;;  %v1237_v33 = vadd.f32 %v1236_v27, %v2645_v47  ;;  %v1238_v34 = vpop.f32.mrb[42].mxu1  ;;  %v1187_v35 = vpop.f32.mrb[43].mxu0 }
 0x214   : > { %v1639_v36 = vrot.slane %v1638_v23, 4  ;;  %v1630_v37 = vrot.slane %v1629_v24, 4  ;;  %v1472_v38 = vmax.f32 %v1235_v25, 0.0  ;;  %v1471_v39 = vmax.f32 %v1184_v26, 0.0  ;;  %v1240_v40 = vpop.f32.mrb[43].mxu1 }
 0x215   : > { %v1622_v41 = vadd.f32 %v1621_v29, %v1620_v15  ;;  %v1648_v58 = vrot.slane %v1647_v30, 4  ;;  %v1558_v42 = vmul.f32 %v2649_v49, %v1470_v31  ;;  %v1473_v43 = vmax.f32 %v1237_v33, 0.0 }
 0x216   : > { %v1640_v44 = vadd.f32 %v1639_v36, %v1638_v23  ;;  %v1631_v45 = vadd.f32 %v1630_v37, %v1629_v24  ;;  %v1560_v46 = vmul.f32 %v2649_v49, %v1472_v38  ;;  %v1559_v22 = vmul.f32 %v2649_v49, %v1471_v39 }
 0x217   : > { %v1623_v51 = vrot.slane %v1622_v41, 2  ;;  %v1649_v52 = vadd.f32 %v1648_v58, %v1647_v30  ;;  %v1561_v53 = vmul.f32 %v2649_v49, %v1473_v43  ;;  %v1186_v1 = vadd.f32 %v1185_v28, %v2651_v50 }
 0x218   : > { %v1641_v55 = vrot.slane %v1640_v44, 2  ;;  %v1632_v56 = vrot.slane %v1631_v45, 2  ;;  %v1239_v32 = vadd.f32 %v1238_v34, %v2651_v50  ;;  %v1188_v60 = vadd.f32 %v1187_v35, %v2651_v50  ;;  %v1191_v61 = vpop.f32.mrb[44].mxu0 }
 0x219   : > { %v1624_v62 = vadd.f32 %v1623_v51, %v1622_v41  ;;  %v1650_v0 = vrot.slane %v1649_v52, 2  ;;  %v1486_v3 = vmax.f32 %v1186_v1, 0.0  ;;  %v1241_v4 = vadd.f32 %v1240_v40, %v2651_v50  ;;  %v1244_v5 = vpop.f32.mrb[44].mxu1  ;;  %v1193_v6 = vpop.f32.mrb[45].mxu0 }
 0x21a   : > { %v1642_v7 = vadd.f32 %v1641_v55, %v1640_v44  ;;  %v1633_v8 = vadd.f32 %v1632_v56, %v1631_v45  ;;  %v1488_v9 = vmax.f32 %v1239_v32, 0.0  ;;  %v1487_v10 = vmax.f32 %v1188_v60, 0.0  ;;  %v1246_v11 = vpop.f32.mrb[45].mxu1  ;;  %v1195_v12 = vpop.f32.mrb[46].mxu0 }
 0x21b   : > { %v1625_v13 = vrot.slane %v1624_v62, 1  ;;  %v1651_v57 = vadd.f32 %v1650_v0, %v1649_v52  ;;  %v1574_v14 = vmul.f32 %v2667_v19, %v1486_v3  ;;  %v1489_v15 = vmax.f32 %v1241_v4, 0.0  ;;  %v1248_v16 = vpop.f32.mrb[46].mxu1  ;;  %v1197_v17 = vpop.f32.mrb[47].mxu0 }
 0x21c   : > { %v1643_v59 = vrot.slane %v1642_v7, 1  ;;  %v1634_v20 = vrot.slane %v1633_v8, 1  ;;  %v1576_v23 = vmul.f32 %v2667_v19, %v1488_v9  ;;  %v1575_v24 = vmul.f32 %v2667_v19, %v1487_v10  ;;  %v1250_v25 = vpop.f32.mrb[47].mxu1 }
 0x21d   : > { %v1626_v26 = vadd.f32 %v1625_v13, %v1624_v62  ;;  %v1652_v27 = vrot.slane %v1651_v57, 1  ;;  %v1654_v28 = vadd.f32 %v1574_v14, %v1558_v42  ;;  %v1577_v29 = vmul.f32 %v2667_v19, %v1489_v15 }
 0x21e   : > { %v1644_v30 = vadd.f32 %v1643_v59, %v1642_v7  ;;  %v1635_v31 = vadd.f32 %v1634_v20, %v1633_v8  ;;  %v1672_v33 = vadd.f32 %v1576_v23, %v1560_v46  ;;  %v1663_v34 = vadd.f32 %v1575_v24, %v1559_v22 }
 0x21f   : > { %v1771_v35 = vadd.f32 %v2669_v21, %v1626_v26  ;;  %v1653_v36 = vadd.f32 %v1652_v27, %v1651_v57  ;;  %v1681_v37 = vadd.f32 %v1577_v29, %v1561_v53  ;;  %v1192_v38 = vadd.f32 %v1191_v61, %v2647_v48 }
 0x220   : > { %v1773_v39 = vadd.f32 %v2669_v21, %v1644_v30  ;;  %v1772_v40 = vadd.f32 %v2669_v21, %v1635_v31  ;;  %v1245_v41 = vadd.f32 %v1244_v5, %v2647_v48  ;;  %v1194_v58 = vadd.f32 %v1193_v6, %v2647_v48  ;;  %v1287_v42 = vpop.f32.mrb[48].mxu0 }
 0x221   : > { %v1774_v43 = vadd.f32 %v2669_v21, %v1653_v36  ;;  %v1502_v44 = vmax.f32 %v1192_v38, 0.0  ;;  %v1247_v45 = vadd.f32 %v1246_v11, %v2647_v48  ;;  %v1196_v46 = vadd.f32 %v1195_v12, %v2655_v54  ;;  %v1340_v22 = vpop.f32.mrb[48].mxu1  ;;  %v1289_v51 = vpop.f32.mrb[49].mxu0 }
 0x222   : > { %v1803_v52 = vcombine.low %v1771_v35, %v1772_v40  ;;  %v1504_v53 = vmax.f32 %v1245_v41, 0.0  ;;  %v1503_v1 = vmax.f32 %v1194_v58, 0.0  ;;  %v1249_v55 = vadd.f32 %v1248_v16, %v2655_v54  ;;  %v1342_v56 = vpop.f32.mrb[49].mxu1  ;;  %v1291_v32 = vpop.f32.mrb[50].mxu0 }
 0x223   : > { %v1804_v60 = vcombine.low %v1773_v39, %v1774_v43  ;;  %v1590_v61 = vmul.f32 %v2653_v2, %v1502_v44  ;;  %v1505_v62 = vmax.f32 %v1247_v45, 0.0  ;;  %v1518_v0 = vmax.f32 %v1196_v46, 0.0  ;;  %v1344_v3 = vpop.f32.mrb[50].mxu1  ;;  %v1293_v4 = vpop.f32.mrb[51].mxu0 }
 0x224   : > { %v2725_v5 = vrot.slane %v1803_v52, %v2665_v18  ;;  %v1592_v6 = vmul.f32 %v2653_v2, %v1504_v53  ;;  %v1591_v7 = vmul.f32 %v2653_v2, %v1503_v1  ;;  %v1520_v8 = vmax.f32 %v1249_v55, 0.0  ;;  %v1346_v9 = vpop.f32.mrb[51].mxu1 }
 0x225   : > { %v2730_v10 = vrot.slane %v1804_v60, %v2665_v18  ;;  %v1655_v11 = vadd.f32 %v1654_v28, %v1590_v61  ;;  %v1593_v12 = vmul.f32 %v2653_v2, %v1505_v62  ;;  %v1606_v13 = vmul.f32 %v2688_v63, %v1518_v0 }
 0x226   : > { %v1673_v57 = vadd.f32 %v1672_v33, %v1592_v6  ;;  %v1664_v14 = vadd.f32 %v1663_v34, %v1591_v7  ;;  %v1608_v15 = vmul.f32 %v2688_v63, %v1520_v8  ;;  %v1198_v16 = vadd.f32 %v1197_v17, %v2655_v54 }
 0x227   : > { %v1682_v59 = vadd.f32 %v1681_v37, %v1593_v12  ;;  %v1656_v20 = vadd.f32 %v1655_v11, %v1606_v13  ;;  %v1251_v23 = vadd.f32 %v1250_v25, %v2655_v54  ;;  %v1288_v24 = vadd.f32 %v1287_v42, %v2645_v47 }
 0x228   : > { %v1674_v26 = vadd.f32 %v1673_v57, %v1608_v15  ;;  %v1519_v27 = vmax.f32 %v1198_v16, 0.0  ;;  %v1341_v28 = vadd.f32 %v1340_v22, %v2645_v47  ;;  %v1290_v29 = vadd.f32 %v1289_v51, %v2645_v47  ;;  %v2740_v30 = vpop.f32.mrb[52].mxu0 }
 0x229   : > { %v1657_v31 = vrot.slane %v1656_v20, 4  ;;  %v1521_v33 = vmax.f32 %v1251_v23, 0.0  ;;  %v1474_v34 = vmax.f32 %v1288_v24, 0.0  ;;  %v1343_v35 = vadd.f32 %v1342_v56, %v2645_v47  ;;  %v2743_v17 = vpop.f32.mrb[52].mxu1  ;;  %v2745_v36 = vpop.f32.mrb[53].mxu0 }
 0x22a   : > { %v1675_v25 = vrot.slane %v1674_v26, 4  ;;  %v1607_v37 = vmul.f32 %v2688_v63, %v1519_v27  ;;  %v1476_v38 = vmax.f32 %v1341_v28, 0.0  ;;  %v1475_v39 = vmax.f32 %v1290_v29, 0.0  ;;  %v2748_v40 = vpop.f32.mrb[53].mxu1  ;;  %v2750_v41 = vpop.f32.mrb[54].mxu0 }
 0x22b   : > { %v1658_v58 = vadd.f32 %v1657_v31, %v1656_v20  ;;  %v1609_v42 = vmul.f32 %v2688_v63, %v1521_v33  ;;  %v1562_v43 = vmul.f32 %v2649_v49, %v1474_v34  ;;  %v1477_v44 = vmax.f32 %v1343_v35, 0.0  ;;  %v1354_v45 = vpop.f32.mrb[54].mxu1  ;;  %v2754_v46 = vpop.f32.mrb[55].mxu0 }
 0x22c   : > { %v1676_v22 = vadd.f32 %v1675_v25, %v1674_v26  ;;  %v1665_v51 = vadd.f32 %v1664_v14, %v1607_v37  ;;  %v1564_v52 = vmul.f32 %v2649_v49, %v1476_v38  ;;  %v1563_v53 = vmul.f32 %v2649_v49, %v1475_v39  ;;  %v2758_v1 = vpop.f32.mrb[55].mxu1 }
 0x22d   : > { %v1659_v55 = vrot.slane %v1658_v58, 2  ;;  %v1683_v56 = vadd.f32 %v1682_v59, %v1609_v42  ;;  %v1565_v60 = vmul.f32 %v2649_v49, %v1477_v44  ;;  %v1292_v61 = vadd.f32 %v1291_v32, %v2651_v50 }
 0x22e   : > { %v1677_v62 = vrot.slane %v1676_v22, 2  ;;  %v1666_v0 = vrot.slane %v1665_v51, 4  ;;  %v1345_v6 = vadd.f32 %v1344_v3, %v2651_v50  ;;  %v1294_v7 = vadd.f32 %v1293_v4, %v2651_v50 }
 0x22f   : > { %v1660_v8 = vadd.f32 %v1659_v55, %v1658_v58  ;;  %v1684_v11 = vrot.slane %v1683_v56, 4  ;;  %v1490_v12 = vmax.f32 %v1292_v61, 0.0  ;;  %v1347_v13 = vadd.f32 %v1346_v9, %v2651_v50 }
 0x230   : > { %v1678_v57 = vadd.f32 %v1677_v62, %v1676_v22  ;;  %v1667_v14 = vadd.f32 %v1666_v0, %v1665_v51  ;;  %v1492_v15 = vmax.f32 %v1345_v6, 0.0  ;;  %v1491_v16 = vmax.f32 %v1294_v7, 0.0  ;;  %v2765_v59 = vpop.f32.mrb[56].mxu0 }
 0x231   : > { %v1661_v20 = vrot.slane %v1660_v8, 1  ;;  %v1685_v23 = vadd.f32 %v1684_v11, %v1683_v56  ;;  %v1578_v32 = vmul.f32 %v2667_v19, %v1490_v12  ;;  %v1493_v24 = vmax.f32 %v1347_v13, 0.0  ;;  %v2768_v26 = vpop.f32.mrb[56].mxu1  ;;  %v2770_v3 = vpop.f32.mrb[57].mxu0 }
 0x232   : > { %v1679_v4 = vrot.slane %v1678_v57, 1  ;;  %v1668_v27 = vrot.slane %v1667_v14, 2  ;;  %v1580_v28 = vmul.f32 %v2667_v19, %v1492_v15  ;;  %v1579_v9 = vmul.f32 %v2667_v19, %v1491_v16  ;;  %v2774_v29 = vpop.f32.mrb[57].mxu1  ;;  %v2776_v31 = vpop.f32.mrb[58].mxu0 }
 0x233   : > { %v1662_v33 = vadd.f32 %v1661_v20, %v1660_v8  ;;  %v1686_v34 = vrot.slane %v1685_v23, 2  ;;  %v1690_v35 = vadd.f32 %v1578_v32, %v1562_v43  ;;  %v1581_v25 = vmul.f32 %v2667_v19, %v1493_v24  ;;  %v2779_v37 = vpop.f32.mrb[58].mxu1  ;;  %v2781_v38 = vpop.f32.mrb[59].mxu0 }
 0x234   : > { %v1680_v39 = vadd.f32 %v1679_v4, %v1678_v57  ;;  %v1669_v58 = vadd.f32 %v1668_v27, %v1667_v14  ;;  %v1708_v42 = vadd.f32 %v1580_v28, %v1564_v52  ;;  %v1699_v44 = vadd.f32 %v1579_v9, %v1563_v53  ;;  %v2783_v22 = vpop.f32.mrb[59].mxu1 }
 0x235   : > { %v1775_v51 = vadd.f32 %v2669_v21, %v1662_v33  ;;  %v1687_v55 = vadd.f32 %v1686_v34, %v1685_v23  ;;  %v1717_v56 = vadd.f32 %v1581_v25, %v1565_v60  ;;  %v1298_v61 = vadd.f32 %v2740_v30, %v2647_v48 }
 0x236   : > { %v1777_v43 = vadd.f32 %v2669_v21, %v1680_v39  ;;  %v1670_v62 = vrot.slane %v1669_v58, 1  ;;  %v1351_v0 = vadd.f32 %v2743_v17, %v2647_v48  ;;  %v1300_v6 = vadd.f32 %v2745_v36, %v2647_v48 }
 0x237   : > { %v1688_v52 = vrot.slane %v1687_v55, 1  ;;  %v1506_v53 = vmax.f32 %v1298_v61, 0.0  ;;  %v1353_v7 = vadd.f32 %v2748_v40, %v2647_v48  ;;  %v1302_v60 = vadd.f32 %v2750_v41, %v2655_v54 }
 0x238   : > { %v1671_v8 = vadd.f32 %v1670_v62, %v1669_v58  ;;  %v1508_v11 = vmax.f32 %v1351_v0, 0.0  ;;  %v1507_v30 = vmax.f32 %v1300_v6, 0.0  ;;  %v1355_v12 = vadd.f32 %v1354_v45, %v2655_v54  ;;  %v2798_v13 = vpop.f32.mrb[60].mxu0 }
 0x239   : > { %v1689_v57 = vadd.f32 %v1688_v52, %v1687_v55  ;;  %v1594_v17 = vmul.f32 %v2653_v2, %v1506_v53  ;;  %v1509_v14 = vmax.f32 %v1353_v7, 0.0  ;;  %v1522_v36 = vmax.f32 %v1302_v60, 0.0  ;;  %v2801_v15 = vpop.f32.mrb[60].mxu1  ;;  %v2803_v16 = vpop.f32.mrb[61].mxu0 }
 0x23a   : > { %v1776_v40 = vadd.f32 %v2669_v21, %v1671_v8  ;;  %v1596_v41 = vmul.f32 %v2653_v2, %v1508_v11  ;;  %v1595_v20 = vmul.f32 %v2653_v2, %v1507_v30  ;;  %v1524_v23 = vmax.f32 %v1355_v12, 0.0  ;;  %v2808_v32 = vpop.f32.mrb[61].mxu1  ;;  %v2810_v45 = vpop.f32.mrb[62].mxu0 }
 0x23b   : > { %v1778_v24 = vadd.f32 %v2669_v21, %v1689_v57  ;;  %v1691_v4 = vadd.f32 %v1690_v35, %v1594_v17  ;;  %v1597_v27 = vmul.f32 %v2653_v2, %v1509_v14  ;;  %v1610_v28 = vmul.f32 %v2688_v63, %v1522_v36  ;;  %v2815_v9 = vpop.f32.mrb[62].mxu1  ;;  %v2817_v33 = vpop.f32.mrb[63].mxu0 }
 0x23c   : > { %v1805_v34 = vcombine.low %v1775_v51, %v1776_v40  ;;  %v1709_v25 = vadd.f32 %v1708_v42, %v1596_v41  ;;  %v1700_v39 = vadd.f32 %v1699_v44, %v1595_v20  ;;  %v1612_v58 = vmul.f32 %v2688_v63, %v1524_v23  ;;  %v2820_v55 = vpop.f32.mrb[63].mxu1 }
 0x23d   : > { %v1806_v61 = vcombine.low %v1777_v43, %v1778_v24  ;;  %v1718_v62 = vadd.f32 %v1717_v56, %v1597_v27  ;;  %v1692_v0 = vadd.f32 %v1691_v4, %v1610_v28  ;;  %v1304_v35 = vadd.f32 %v2754_v46, %v2655_v54 }
 0x23e   : > { %v2825_v6 = vrot.slane %v1805_v34, %v2665_v18  ;;  %v1710_v52 = vadd.f32 %v1709_v25, %v1612_v58  ;;  %v1357_v53 = vadd.f32 %v2758_v1, %v2655_v54  ;;  %v1394_v42 = vadd.f32 %v2765_v59, %v2645_v47 }
 0x23f   : > { %v2832_v44 = vrot.slane %v1806_v61, %v2665_v18  ;;  %v1693_v51 = vrot.slane %v1692_v0, 4  ;;  %v1523_v43 = vmax.f32 %v1304_v35, 0.0  ;;  %v1447_v56 = vadd.f32 %v2768_v26, %v2645_v47 }
 0x240   : > { %v1711_v7 = vrot.slane %v1710_v52, 4  ;;  %v1525_v46 = vmax.f32 %v1357_v53, 0.0  ;;  %v1478_v60 = vmax.f32 %v1394_v42, 0.0  ;;  %v1396_v8 = vadd.f32 %v2770_v3, %v2645_v47 }
 0x241   : > { %v1694_v11 = vadd.f32 %v1693_v51, %v1692_v0  ;;  %v1611_v1 = vmul.f32 %v2688_v63, %v1523_v43  ;;  %v1480_v30 = vmax.f32 %v1447_v56, 0.0  ;;  %v1449_v59 = vadd.f32 %v2774_v29, %v2645_v47 }
 0x242   : > { %v1712_v12 = vadd.f32 %v1711_v7, %v1710_v52  ;;  %v1613_v57 = vmul.f32 %v2688_v63, %v1525_v46  ;;  %v1566_v17 = vmul.f32 %v2649_v49, %v1478_v60  ;;  %v1479_v14 = vmax.f32 %v1396_v8, 0.0 }
 0x243   : > { %v1695_v26 = vrot.slane %v1694_v11, 2  ;;  %v1701_v36 = vadd.f32 %v1700_v39, %v1611_v1  ;;  %v1568_v40 = vmul.f32 %v2649_v49, %v1480_v30  ;;  %v1481_v41 = vmax.f32 %v1449_v59, 0.0 }
 0x244   : > { %v1713_v20 = vrot.slane %v1712_v12, 2  ;;  %v1719_v3 = vadd.f32 %v1718_v62, %v1613_v57  ;;  %v1567_v23 = vmul.f32 %v2649_v49, %v1479_v14  ;;  %v1398_v24 = vadd.f32 %v2776_v31, %v2651_v50 }
 0x245   : > { %v1696_v4 = vadd.f32 %v1695_v26, %v1694_v11  ;;  %v1702_v47 = vrot.slane %v1701_v36, 4  ;;  %v1569_v29 = vmul.f32 %v2649_v49, %v1481_v41  ;;  %v1451_v27 = vadd.f32 %v2779_v37, %v2651_v50 }
 0x246   : > { %v1714_v28 = vadd.f32 %v1713_v20, %v1712_v12  ;;  %v1720_v34 = vrot.slane %v1719_v3, 4  ;;  %v1494_v25 = vmax.f32 %v1398_v24, 0.0  ;;  %v1400_v39 = vadd.f32 %v2781_v38, %v2651_v50 }
 0x247   : > { %v1697_v58 = vrot.slane %v1696_v4, 1  ;;  %v1703_v61 = vadd.f32 %v1702_v47, %v1701_v36  ;;  %v1496_v62 = vmax.f32 %v1451_v27, 0.0  ;;  %v1453_v0 = vadd.f32 %v2783_v22, %v2651_v50 }
 0x248   : > { %v1715_v31 = vrot.slane %v1714_v28, 1  ;;  %v1721_v35 = vadd.f32 %v1720_v34, %v1719_v3  ;;  %v1582_v52 = vmul.f32 %v2667_v19, %v1494_v25  ;;  %v1495_v49 = vmax.f32 %v1400_v39, 0.0 }
 0x249   : > { %v1698_v53 = vadd.f32 %v1697_v58, %v1696_v4  ;;  %v1704_v42 = vrot.slane %v1703_v61, 2  ;;  %v1584_v37 = vmul.f32 %v2667_v19, %v1496_v62  ;;  %v1497_v51 = vmax.f32 %v1453_v0, 0.0 }
 0x24a   : > { %v1716_v43 = vadd.f32 %v1715_v31, %v1714_v28  ;;  %v1722_v56 = vrot.slane %v1721_v35, 2  ;;  %v1726_v7 = vadd.f32 %v1582_v52, %v1566_v17  ;;  %v1583_v38 = vmul.f32 %v2667_v19, %v1495_v49 }
 0x24b   : > { %v1779_v46 = vadd.f32 %v2669_v21, %v1698_v53  ;;  %v1705_v60 = vadd.f32 %v1704_v42, %v1703_v61  ;;  %v1744_v8 = vadd.f32 %v1584_v37, %v1568_v40  ;;  %v1585_v50 = vmul.f32 %v2667_v19, %v1497_v51 }
 0x24c   : > { %v1781_v22 = vadd.f32 %v2669_v21, %v1716_v43  ;;  %v1723_v11 = vadd.f32 %v1722_v56, %v1721_v35  ;;  %v1735_v1 = vadd.f32 %v1583_v38, %v1567_v23  ;;  %v1404_v30 = vadd.f32 %v2798_v13, %v2647_v48 }
 0x24d   : > { %v1706_v59 = vrot.slane %v1705_v60, 1  ;;  %v1753_v12 = vadd.f32 %v1585_v50, %v1569_v29  ;;  %v1457_v57 = vadd.f32 %v2801_v15, %v2647_v48  ;;  %v1406_v17 = vadd.f32 %v2803_v16, %v2647_v48 }
 0x24e   : > { %v1724_v14 = vrot.slane %v1723_v11, 1  ;;  %v1510_v26 = vmax.f32 %v1404_v30, 0.0  ;;  %v1459_v19 = vadd.f32 %v2808_v32, %v2647_v48  ;;  %v1408_v36 = vadd.f32 %v2810_v45, %v2655_v54 }
 0x24f   : > { %v1707_v40 = vadd.f32 %v1706_v59, %v1705_v60  ;;  %v1512_v41 = vmax.f32 %v1457_v57, 0.0  ;;  %v1511_v20 = vmax.f32 %v1406_v17, 0.0  ;;  %v1461_v13 = vadd.f32 %v2815_v9, %v2655_v54 }
 0x250   : > { %v1725_v3 = vadd.f32 %v1724_v14, %v1723_v11  ;;  %v1598_v15 = vmul.f32 %v2653_v2, %v1510_v26  ;;  %v1513_v23 = vmax.f32 %v1459_v19, 0.0  ;;  %v1526_v24 = vmax.f32 %v1408_v36, 0.0 }
 0x251   : > { %v1780_v16 = vadd.f32 %v2669_v21, %v1707_v40  ;;  %v1600_v4 = vmul.f32 %v2653_v2, %v1512_v41  ;;  %v1599_v48 = vmul.f32 %v2653_v2, %v1511_v20  ;;  %v1528_v32 = vmax.f32 %v1461_v13, 0.0 }
 0x252   : > { %v1782_v45 = vadd.f32 %v2669_v21, %v1725_v3  ;;  %v1727_v47 = vadd.f32 %v1726_v7, %v1598_v15  ;;  %v1601_v29 = vmul.f32 %v2653_v2, %v1513_v23  ;;  %v1614_v27 = vmul.f32 %v2688_v63, %v1526_v24 }
 0x253   : > { %v1852_v9 = vcombine.low %v1779_v46, %v1780_v16  ;;  %v1745_v28 = vadd.f32 %v1744_v8, %v1600_v4  ;;  %v1736_v34 = vadd.f32 %v1735_v1, %v1599_v48  ;;  %v1616_v25 = vmul.f32 %v2688_v63, %v1528_v32 }
 0x254   : > { %v1853_v39 = vcombine.low %v1781_v22, %v1782_v45  ;;  %v1754_v58 = vadd.f32 %v1753_v12, %v1601_v29  ;;  %v1728_v61 = vadd.f32 %v1727_v47, %v1614_v27  ;;  %v1410_v62 = vadd.f32 %v2817_v33, %v2655_v54 }
 0x255   : > { %v1862_v0 = vrot.slane %v1852_v9, %v2665_v18  ;;  %v1746_v31 = vadd.f32 %v1745_v28, %v1616_v25  ;;  %v1463_v2 = vadd.f32 %v2820_v55, %v2655_v54  ;;  %v1835_v35 = vcombine.low %v2725_v5, %v2730_v10 }
 0x256   : > { %v1869_v52 = vrot.slane %v1853_v39, %v2665_v18  ;;  %v1729_v49 = vrot.slane %v1728_v61, 4  ;;  %v1527_v53 = vmax.f32 %v1410_v62, 0.0  ;;  %v1836_v42 = vcombine.low %v2825_v6, %v2832_v44 }
 0x257   : > { %v1747_v37 = vrot.slane %v1746_v31, 4  ;;  %v1529_v51 = vmax.f32 %v1463_v2, 0.0  ;;  %v1843_v33 = vrot.slane %v1835_v35, %v2665_v18 }
 0x258   : > { %v1730_v43 = vadd.f32 %v1729_v49, %v1728_v61  ;;  %v1615_v56 = vmul.f32 %v2688_v63, %v1527_v53  ;;  %v1850_v54 = vrot.slane %v1836_v42, %v2665_v18  ;;  %v1884_v55 = vcombine.low %v1862_v0, %v1869_v52 }
 0x259   : > { %v1748_v7 = vadd.f32 %v1747_v37, %v1746_v31  ;;  %v1617_v5 = vmul.f32 %v2688_v63, %v1529_v51 }
 0x25a   : > { %v1731_v10 = vrot.slane %v1730_v43, 2  ;;  %v1737_v38 = vadd.f32 %v1736_v34, %v1615_v56  ;;  %v1851_v46 = vcombine.low %v1843_v33, %v1850_v54  ;;  %v1892_v32 = vrot.slane %v1884_v55, %v2665_v18 }
 0x25b   : > { %v1749_v60 = vrot.slane %v1748_v7, 2  ;;  %v1755_v8 = vadd.f32 %v1754_v58, %v1617_v5 }
 0x25c   : > { %v1732_v50 = vadd.f32 %v1731_v10, %v1730_v43  ;;  %v1738_v6 = vrot.slane %v1737_v38, 4  ;;  %1903 = vst [vmem:[%s2895_s19] sm:$0xff] %v1851_v46 }
 0x25d   : > { %v1750_v44 = vadd.f32 %v1749_v60, %v1748_v7  ;;  %v1756_v22 = vrot.slane %v1755_v8, 4 }
 0x25e   : > { %v1733_v11 = vrot.slane %v1732_v50, 1  ;;  %v1739_v1 = vadd.f32 %v1738_v6, %v1737_v38 }
 0x25f   : > { %v1751_v30 = vrot.slane %v1750_v44, 1  ;;  %v1757_v59 = vadd.f32 %v1756_v22, %v1755_v8 }
 0x260   : > { %v1740_v12 = vrot.slane %v1739_v1, 2  ;;  %v1734_v63 = vadd.f32 %v1733_v11, %v1732_v50 }
 0x261   : > { %v1758_v57 = vrot.slane %v1757_v59, 2  ;;  %v1752_v14 = vadd.f32 %v1751_v30, %v1750_v44 }
 0x262   : > { %v1741_v17 = vadd.f32 %v1740_v12, %v1739_v1  ;;  %v1783_v40 = vadd.f32 %v2669_v21, %v1734_v63 }
 0x263   : > { %v1759_v26 = vadd.f32 %v1758_v57, %v1757_v59  ;;  %v1785_v20 = vadd.f32 %v2669_v21, %v1752_v14 }
 0x264   : > { %v1742_v19 = vrot.slane %v1741_v17, 1 }
 0x265   : > { %v1760_v36 = vrot.slane %v1759_v26, 1 }
 0x266   : > { %v1743_v41 = vadd.f32 %v1742_v19, %v1741_v17 }
 0x267   : > { %v1761_v13 = vadd.f32 %v1760_v36, %v1759_v26 }
 0x268   : > { %v1784_v3 = vadd.f32 %v2669_v21, %v1743_v41 }
 0x269   : > { %v1786_v15 = vadd.f32 %v2669_v21, %v1761_v13 }
 0x26a   : > { %v1854_v23 = vcombine.low %v1783_v40, %v1784_v3 }
 0x26b   : > { %v1855_v24 = vcombine.low %v1785_v20, %v1786_v15 }
 0x26c   : > { %v1876_v16 = vrot.slane %v1854_v23, %v2665_v18 }
 0x26d   : > { %v1883_v4 = vrot.slane %v1855_v24, %v2665_v18 }
 0x26f   : > { %v1885_v48 = vcombine.low %v1876_v16, %v1883_v4 }
 0x271   : > { %v1899_v45 = vrot.slane %v1885_v48, %v2665_v18 }
 0x273   : > { %v1900_v47 = vcombine.low %v1892_v32, %v1899_v45 }
 0x275   : > { %1904 = vst [vmem:[%s2895_s19 + $0x8] sm:$0xff] %v1900_v47 }
 0x276   : > { %2166 = shalt.err (!%p2163_p3)
}
 0x277   : > { %s2167_s12 = scalar_lea.hbm %s2911_s10, 256  ;;  %s2171_s25 = scalar_lea.hbm %s2963_s7, 512 }
 0x278   : > { %p2168_p5 = scmp.ne.s32.totalorder %s2911_s10, %s2167_s12  ;;  %p2172_p9 = scmp.lt.u32.totalorder %s2911_s10, %s2963_s7 }
 0x279   : > { %p2173_p0 = scmp.lt.u32.totalorder %s2171_s25, %s2167_s12  ;;  %p2175_p6 = scmp.lt.u32.totalorder %s2167_s12, %s2911_s10 }
 0x27a   : > { %p2169_p7 = pnand %p2168_p5, %p2971_p11 }
 0x27b   : > { %p2174_p2 = por %p2173_p0, %p2172_p9 }
 0x27c   : > { %p2170_p8 = pneg %p2169_p7 }
 0x27d   : > { %p2176_p12 = por %p2175_p6, %p2174_p2 }
 0x27f   : > { %p2177_p13 = pnand %p2176_p12, %p2170_p8 }
 0x281   : > { %2180 = shalt.err (!%p2177_p13)
}
 0x282   : > { %2068 = dma.vmem_to_hbm [thread:$0]  (%p2971_p11), %s2913_s22, 256, %s2911_s10, %s1906_s17  }
 0x283 PF: > { %s1932_s20 = sand.u32 1, %s2207_s26   ;;  %p2972_p4 = scmp.ne.s32.totalorder %s2968_s15, 0 }
 0x284   : > { %p2973_p10 = scmp.ge.s32.totalorder %s2219_s29, 2  ;;  %s1933_s30 = scalar_lea.sflag [#allocation5], %s1932_s20 }
 0x286   : > { %p2075_p1 = pnand %p2973_p10, %p2972_p4 }
 0x288   : > { %2202 = dma.done.wait (!%p2075_p1), %s1933_s30, 256  }
 0x289   : > { %2204 = vsyncadd (!%p2075_p1), %s1933_s30, 4294967040  ;;  %p22_p3 = scmp.ge.s32.totalorder %s2296_s8, 4   ;;  %s2974_s26 = smov %s2211_s27 }
 0x28a   : > { %s2975_s27 = smov %s2215_s28  ;;  %s2976_s28 = smov %s2308_s11 }
 0x28b   : > { %s2977_s29 = smov %s2296_s8  ;;  %24 = sbr.rel (!%p22_p3) target bundleno = 8 (0x8), region = 93 }
 0x292   :  { %1938 = vsyncpa [#allocation4], 1 }
 0x293   :  { %1940 = vsyncpa [#allocation4 + $0x1], 1 }
 0x294   :  { %1941 = vsyncpa [#allocation5], 1 }
 0x295   :  { %1943 = vsyncpa [#allocation5 + $0x1], 1 }

</bundles_post_ra>
